<compile_context>
chip_gen: v6e
topology: v6e:2x2x1
jax: 0.10.0
libtpu: 0.0.40
codegen_flags: <defaults>
</compile_context>

<pallas_src>
import functools

import jax
import jax.numpy as jnp
from jax import lax
from jax.experimental import pallas as pl
from jax.experimental.pallas import tpu as pltpu


def _erf_approx(x):
    # Abramowitz & Stegun 7.1.26 rational approximation of erf.
    a1, a2, a3, a4, a5 = (0.254829592, -0.284496736, 1.421413741,
                          -1.453152027, 1.061405429)
    p = 0.3275911
    ax = jnp.abs(x)
    t = pl.reciprocal(1.0 + p * ax, approx=True)        # EUP slot (nearly free)
    poly = ((((a5 * t + a4) * t + a3) * t + a2) * t + a1) * t
    y = 1.0 - poly * jnp.exp(-ax * ax)                   # EUP exp
    return jnp.where(x >= 0, y, -y)


def _gelu_exact(x):
    return 0.5 * x * (1.0 + _erf_approx(x * 0.7071067811865476))


def mlp_kernel(H, W, x_ref, w1_ref, b1_ref, wdw_ref, bdw_ref, w2_ref, b2_ref,
               o_ref):
    """One batch element per grid step, spatial-minor layout.

    x_ref:   (1, Cin, H*W)
    w1_ref:  (Chid, Cin)     b1_ref:  (Chid, 1)
    wdw_ref: (Chid, 9)       bdw_ref: (Chid, 1)   # 3x3 taps, row-major (ky*3+kx)
    w2_ref:  (Cout, Chid)    b2_ref:  (Cout, 1)
    o_ref:   (1, Cout, H*W)
    """
    HW = H * W
    chid = w1_ref.shape[0]

    # fc1: 1x1 conv == channel matmul on the MXU; result (Chid, H*W), lane-dense.
    h = jnp.dot(w1_ref[...], x_ref[0],
                preferred_element_type=jnp.float32) + b1_ref[...]

    # Edge-validity masks over the flattened spatial axis (built once, reused).
    lane = lax.broadcasted_iota(jnp.int32, (chid, HW), 1)
    col = lane % W
    ok_l = col >= 1               # neighbour at dx = -1 exists
    ok_r = col <= W - 2           # neighbour at dx = +1 exists
    ok_u = lane >= W              # neighbour at dy = -1 exists
    ok_d = lane < (H - 1) * W     # neighbour at dy = +1 exists

    taps = wdw_ref[...]           # (Chid, 9), tap index k = (dy+1)*3 + (dx+1)

    # Depthwise 3x3 conv: each neighbour (dy, dx) is ONE whole-image lane roll
    # with shift = -(dy*W + dx) mod HW and a combined validity mask (wrapped
    # lanes are exactly the masked-out ones), then a per-channel-tap FMA.
    neighbours = (
        # (shift,      mask,         tap index k)
        (1,           ok_l,          3),   # ( 0, -1)
        (HW - 1,      ok_r,          5),   # ( 0, +1)
        (W,           ok_u,          1),   # (-1,  0)
        (HW - W,      ok_d,          7),   # (+1,  0)
        (W + 1,       ok_u & ok_l,   0),   # (-1, -1)
        (W - 1,       ok_u & ok_r,   2),   # (-1, +1)
        (HW - W + 1,  ok_d & ok_l,   6),   # (+1, -1)
        (HW - W - 1,  ok_d & ok_r,   8),   # (+1, +1)
    )
    d = taps[:, 4:5] * h + bdw_ref[...]    # centre tap + bias
    for shift, mask, k in neighbours:
        v = jnp.where(mask, pltpu.roll(h, shift=shift, axis=1), 0.0)
        d = d + taps[:, k:k + 1] * v

    # Exact (erf) GELU on the whole slab; Dropout(p=0.0) is identity.
    g = _gelu_exact(d)

    # fc2: 1x1 conv == channel matmul; output stays lane-dense (Cout, H*W).
    o_ref[0] = jnp.dot(w2_ref[...], g,
                       preferred_element_type=jnp.float32) + b2_ref[...]


def mlp_pallas(x_nchw, params):
    w1, b1, wdw, bdw, w2, b2 = params
    N, Cin, H, W = x_nchw.shape
    Chid = w1.shape[1]
    Cout = w2.shape[1]
    HW = H * W

    # Spatial-minor: NCHW -> (N, C, H*W) is a pure reshape (no transposes).
    x = x_nchw.reshape(N, Cin, HW)
    # Tiny weight re-layouts so channels sit in sublanes inside the kernel.
    w1k = jnp.transpose(w1)          # (Chid, Cin)
    b1k = b1.reshape(Chid, 1)
    wdwk = jnp.transpose(wdw)        # (Chid, 9)
    bdwk = bdw.reshape(Chid, 1)
    w2k = jnp.transpose(w2)          # (Cout, Chid)
    b2k = b2.reshape(Cout, 1)

    kernel = functools.partial(mlp_kernel, H, W)
    flops = 2 * N * HW * (Cin * Chid + 9 * Chid + Chid * Cout)
    bytes_accessed = 4 * (x.size + N * Cout * HW + w1.size + b1.size +
                          wdw.size + bdw.size + w2.size + b2.size)

    # NOTE: for production VAN sizes (e.g. 56x56 with Chid in the hundreds) add
    # a spatial row-tile grid axis with a 1-row halo to bound per-step VMEM (v7x).
    out = pl.pallas_call(
        kernel,
        out_shape=jax.ShapeDtypeStruct((N, Cout, HW), jnp.float32),
        grid_spec=pltpu.PrefetchScalarGridSpec(
            num_scalar_prefetch=0,
            grid=(N,),
            in_specs=[
                pl.BlockSpec((1, Cin, HW), lambda n: (n, 0, 0)),
                pl.BlockSpec((Chid, Cin), lambda n: (0, 0)),
                pl.BlockSpec((Chid, 1), lambda n: (0, 0)),
                pl.BlockSpec((Chid, 9), lambda n: (0, 0)),
                pl.BlockSpec((Chid, 1), lambda n: (0, 0)),
                pl.BlockSpec((Cout, Chid), lambda n: (0, 0)),
                pl.BlockSpec((Cout, 1), lambda n: (0, 0)),
            ],
            out_specs=pl.BlockSpec((1, Cout, HW), lambda n: (n, 0, 0)),
        ),
        compiler_params=pltpu.CompilerParams(
            dimension_semantics=("parallel",)),
        cost_estimate=pl.CostEstimate(
            flops=flops,
            transcendentals=2 * N * HW * Chid,   # exp + reciprocal per element
            bytes_accessed=bytes_accessed),
    )(x, w1k, b1k, wdwk, bdwk, w2k, b2k)

    # Lane-dense kernel output only needs a reshape back to NCHW.
    return out.reshape(N, Cout, H, W)


def mlp_ref(x_nchw, params):
    """Pure-JAX reference with identical semantics (NCHW in/out)."""
    w1, b1, wdw, bdw, w2, b2 = params
    N, Cin, H, W = x_nchw.shape
    Chid = w1.shape[1]
    x = jnp.transpose(x_nchw, (0, 2, 3, 1))                       # NHWC
    h = jnp.einsum('nhwc,cd->nhwd', x, w1) + b1.reshape(-1)       # fc1
    k = wdw.reshape(3, 3, 1, Chid)                                # HWIO, groups=Chid
    d = lax.conv_general_dilated(
        h, k, window_strides=(1, 1), padding=((1, 1), (1, 1)),
        dimension_numbers=('NHWC', 'HWIO', 'NHWC'),
        feature_group_count=Chid) + bdw.reshape(-1)               # dwconv
    g = 0.5 * d * (1.0 + lax.erf(d / jnp.sqrt(2.0)))              # exact GELU
    y = jnp.einsum('nhwd,de->nhwe', g, w2) + b2.reshape(-1)       # fc2
    return jnp.transpose(y, (0, 3, 1, 2))


if __name__ == "__main__":
    # Small shapes: in_features=4, hidden_features=32, out_features=4 (default).
    N, Cin, H, W = 2, 4, 16, 16
    Chid, Cout = 32, 4

    key = jax.random.PRNGKey(0)
    ks = jax.random.split(key, 7)
    # Deterministic synthetic parameters (PyTorch shapes: fc1 (Chid,Cin,1,1),
    # dwconv (Chid,1,3,3), fc2 (Cout,Chid,1,1)) stored in matmul-friendly form.
    w1 = jax.random.normal(ks[0], (Cin, Chid), jnp.float32) * 0.2
    b1 = jax.random.normal(ks[1], (1, Chid), jnp.float32) * 0.1
    wdw = jax.random.normal(ks[2], (9, Chid), jnp.float32) * 0.2   # (3*3, Chid)
    bdw = jax.random.normal(ks[3], (1, Chid), jnp.float32) * 0.1
    w2 = jax.random.normal(ks[4], (Chid, Cout), jnp.float32) * 0.2
    b2 = jax.random.normal(ks[5], (1, Cout), jnp.float32) * 0.1
    x = jax.random.normal(ks[6], (N, Cin, H, W), jnp.float32)
    params = (w1, b1, wdw, bdw, w2, b2)

    mlp_jit = jax.jit(mlp_pallas)
    out = jax.block_until_ready(mlp_jit(x, params))
    ref = mlp_ref(x, params)

    assert out.shape == (N, Cout, H, W)
    max_err = float(jnp.max(jnp.abs(out - ref)))
    assert jnp.allclose(out, ref, atol=2e-2, rtol=2e-2), max_err
    print("KERNEL_OK")
</pallas_src>

<mosaic_0001>
module attributes {stable_mosaic.version = 11 : i64} {
  func.func @mlp_kernel(%arg0: i32, %arg1: memref<1x4x256xf32, #tpu.memory_space<vmem>>, %arg2: memref<32x4xf32, #tpu.memory_space<vmem>>, %arg3: memref<32x1xf32, #tpu.memory_space<vmem>>, %arg4: memref<32x9xf32, #tpu.memory_space<vmem>>, %arg5: memref<32x1xf32, #tpu.memory_space<vmem>>, %arg6: memref<4x32xf32, #tpu.memory_space<vmem>>, %arg7: memref<4x1xf32, #tpu.memory_space<vmem>>, %arg8: memref<1x4x256xf32, #tpu.memory_space<vmem>>) attributes {dimension_semantics = [#tpu.dimension_semantics<parallel>], iteration_bounds = array<i64: 2>, scalar_prefetch = 0 : i64, scratch_operands = 0 : i64, tpu.core_type = #tpu.core_type<tc>, window_params = [{transform_indices = @transform_0, window_bounds = array<i64: 1, 4, 256>}, {pipeline_mode = #tpu.pipeline_mode<synchronous>, transform_indices = @transform_1, window_bounds = array<i64: 32, 4>}, {pipeline_mode = #tpu.pipeline_mode<synchronous>, transform_indices = @transform_2, window_bounds = array<i64: 32, 1>}, {pipeline_mode = #tpu.pipeline_mode<synchronous>, transform_indices = @transform_3, window_bounds = array<i64: 32, 9>}, {pipeline_mode = #tpu.pipeline_mode<synchronous>, transform_indices = @transform_4, window_bounds = array<i64: 32, 1>}, {pipeline_mode = #tpu.pipeline_mode<synchronous>, transform_indices = @transform_5, window_bounds = array<i64: 4, 32>}, {pipeline_mode = #tpu.pipeline_mode<synchronous>, transform_indices = @transform_6, window_bounds = array<i64: 4, 1>}, {transform_indices = @transform_7, window_bounds = array<i64: 1, 4, 256>}]} {
    %c0 = arith.constant 0 : index
    %c0_0 = arith.constant 0 : index
    %0 = vector.load %arg2[%c0, %c0_0] : memref<32x4xf32, #tpu.memory_space<vmem>>, vector<32x4xf32>
    %c0_1 = arith.constant 0 : index
    %c0_2 = arith.constant 0 : index
    %c0_3 = arith.constant 0 : index
    %1 = vector.load %arg1[%c0_1, %c0_2, %c0_3] : memref<1x4x256xf32, #tpu.memory_space<vmem>>, vector<1x4x256xf32>
    %2 = vector.shape_cast %1 : vector<1x4x256xf32> to vector<4x256xf32>
    %cst = arith.constant dense<0.000000e+00> : vector<32x256xf32>
    %3 = tpu.matmul %0, %2, %cst {dimension_numbers = #tpu.dot_dimension_numbers<[1], [0], [0], [1], [0, 0, 1, 1], [], []>} : vector<32x4xf32>, vector<4x256xf32>, vector<32x256xf32> -> vector<32x256xf32>
    %c0_4 = arith.constant 0 : index
    %c0_5 = arith.constant 0 : index
    %4 = vector.load %arg3[%c0_4, %c0_5] : memref<32x1xf32, #tpu.memory_space<vmem>>, vector<32x1xf32>
    %5 = vector.broadcast %4 : vector<32x1xf32> to vector<32x256xf32>
    %6 = arith.addf %3, %5 : vector<32x256xf32>
    %7 = tpu.iota {dimensions = array<i32: 1>} : vector<32x256xi32>
    %c16_i32 = arith.constant 16 : i32
    %c0_i32 = arith.constant 0 : i32
    %8 = arith.cmpi eq, %c16_i32, %c0_i32 : i32
    %c1_i32 = arith.constant 1 : i32
    %9 = arith.select %8, %c1_i32, %c16_i32 : i32
    %10 = vector.broadcast %9 : i32 to vector<32x256xi32>
    %11 = arith.remsi %7, %10 : vector<32x256xi32>
    %c0_i32_6 = arith.constant 0 : i32
    %12 = vector.broadcast %c0_i32_6 : i32 to vector<32x256xi32>
    %13 = arith.cmpi ne, %11, %12 : vector<32x256xi32>
    %c0_i32_7 = arith.constant 0 : i32
    %14 = vector.broadcast %c0_i32_7 : i32 to vector<32x256xi32>
    %15 = arith.cmpi slt, %11, %14 : vector<32x256xi32>
    %c0_i32_8 = arith.constant 0 : i32
    %16 = arith.cmpi slt, %9, %c0_i32_8 : i32
    %17 = vector.broadcast %16 : i1 to vector<32x256xi1>
    %18 = vector.broadcast %17 : vector<32x256xi1> to vector<32x256xi1>
    %19 = arith.xori %15, %18 : vector<32x256xi1>
    %20 = arith.andi %19, %13 : vector<32x256xi1>
    %21 = vector.broadcast %9 : i32 to vector<32x256xi32>
    %22 = arith.addi %11, %21 : vector<32x256xi32>
    %23 = arith.select %20, %22, %11 : vector<32x256xi1>, vector<32x256xi32>
    %c1_i32_9 = arith.constant 1 : i32
    %24 = vector.broadcast %c1_i32_9 : i32 to vector<32x256xi32>
    %25 = arith.cmpi sge, %23, %24 : vector<32x256xi32>
    %c14_i32 = arith.constant 14 : i32
    %26 = vector.broadcast %c14_i32 : i32 to vector<32x256xi32>
    %27 = arith.cmpi sle, %23, %26 : vector<32x256xi32>
    %c16_i32_10 = arith.constant 16 : i32
    %28 = vector.broadcast %c16_i32_10 : i32 to vector<32x256xi32>
    %29 = arith.cmpi sge, %7, %28 : vector<32x256xi32>
    %c240_i32 = arith.constant 240 : i32
    %30 = vector.broadcast %c240_i32 : i32 to vector<32x256xi32>
    %31 = arith.cmpi slt, %7, %30 : vector<32x256xi32>
    %c0_11 = arith.constant 0 : index
    %c0_12 = arith.constant 0 : index
    %32 = vector.load %arg4[%c0_11, %c0_12] : memref<32x9xf32, #tpu.memory_space<vmem>>, vector<32x9xf32>
    %33 = arith.andi %29, %25 : vector<32x256xi1>
    %34 = arith.andi %29, %27 : vector<32x256xi1>
    %35 = arith.andi %31, %25 : vector<32x256xi1>
    %36 = arith.andi %31, %27 : vector<32x256xi1>
    %37 = vector.extract_strided_slice %32 {offsets = [0, 4], sizes = [32, 1], strides = [1, 1]} : vector<32x9xf32> to vector<32x1xf32>
    %38 = vector.broadcast %37 : vector<32x1xf32> to vector<32x256xf32>
    %39 = arith.mulf %38, %6 : vector<32x256xf32>
    %c0_13 = arith.constant 0 : index
    %c0_14 = arith.constant 0 : index
    %40 = vector.load %arg5[%c0_13, %c0_14] : memref<32x1xf32, #tpu.memory_space<vmem>>, vector<32x1xf32>
    %41 = vector.broadcast %40 : vector<32x1xf32> to vector<32x256xf32>
    %42 = arith.addf %39, %41 : vector<32x256xf32>
    %c1_i32_15 = arith.constant 1 : i32
    %43 = tpu.dynamic_rotate %6 by %c1_i32_15 dim 1 : vector<32x256xf32>, i32 -> vector<32x256xf32>
    %cst_16 = arith.constant 0.000000e+00 : f32
    %44 = vector.broadcast %cst_16 : f32 to vector<32x256xf32>
    %45 = arith.select %25, %43, %44 : vector<32x256xi1>, vector<32x256xf32>
    %46 = vector.extract_strided_slice %32 {offsets = [0, 3], sizes = [32, 1], strides = [1, 1]} : vector<32x9xf32> to vector<32x1xf32>
    %47 = vector.broadcast %46 : vector<32x1xf32> to vector<32x256xf32>
    %48 = arith.mulf %47, %45 : vector<32x256xf32>
    %49 = arith.addf %42, %48 : vector<32x256xf32>
    %c255_i32 = arith.constant 255 : i32
    %50 = tpu.dynamic_rotate %6 by %c255_i32 dim 1 : vector<32x256xf32>, i32 -> vector<32x256xf32>
    %cst_17 = arith.constant 0.000000e+00 : f32
    %51 = vector.broadcast %cst_17 : f32 to vector<32x256xf32>
    %52 = arith.select %27, %50, %51 : vector<32x256xi1>, vector<32x256xf32>
    %53 = vector.extract_strided_slice %32 {offsets = [0, 5], sizes = [32, 1], strides = [1, 1]} : vector<32x9xf32> to vector<32x1xf32>
    %54 = vector.broadcast %53 : vector<32x1xf32> to vector<32x256xf32>
    %55 = arith.mulf %54, %52 : vector<32x256xf32>
    %56 = arith.addf %49, %55 : vector<32x256xf32>
    %c16_i32_18 = arith.constant 16 : i32
    %57 = tpu.dynamic_rotate %6 by %c16_i32_18 dim 1 : vector<32x256xf32>, i32 -> vector<32x256xf32>
    %cst_19 = arith.constant 0.000000e+00 : f32
    %58 = vector.broadcast %cst_19 : f32 to vector<32x256xf32>
    %59 = arith.select %29, %57, %58 : vector<32x256xi1>, vector<32x256xf32>
    %60 = vector.extract_strided_slice %32 {offsets = [0, 1], sizes = [32, 1], strides = [1, 1]} : vector<32x9xf32> to vector<32x1xf32>
    %61 = vector.broadcast %60 : vector<32x1xf32> to vector<32x256xf32>
    %62 = arith.mulf %61, %59 : vector<32x256xf32>
    %63 = arith.addf %56, %62 : vector<32x256xf32>
    %c240_i32_20 = arith.constant 240 : i32
    %64 = tpu.dynamic_rotate %6 by %c240_i32_20 dim 1 : vector<32x256xf32>, i32 -> vector<32x256xf32>
    %cst_21 = arith.constant 0.000000e+00 : f32
    %65 = vector.broadcast %cst_21 : f32 to vector<32x256xf32>
    %66 = arith.select %31, %64, %65 : vector<32x256xi1>, vector<32x256xf32>
    %67 = vector.extract_strided_slice %32 {offsets = [0, 7], sizes = [32, 1], strides = [1, 1]} : vector<32x9xf32> to vector<32x1xf32>
    %68 = vector.broadcast %67 : vector<32x1xf32> to vector<32x256xf32>
    %69 = arith.mulf %68, %66 : vector<32x256xf32>
    %70 = arith.addf %63, %69 : vector<32x256xf32>
    %c17_i32 = arith.constant 17 : i32
    %71 = tpu.dynamic_rotate %6 by %c17_i32 dim 1 : vector<32x256xf32>, i32 -> vector<32x256xf32>
    %cst_22 = arith.constant 0.000000e+00 : f32
    %72 = vector.broadcast %cst_22 : f32 to vector<32x256xf32>
    %73 = arith.select %33, %71, %72 : vector<32x256xi1>, vector<32x256xf32>
    %74 = vector.extract_strided_slice %32 {offsets = [0, 0], sizes = [32, 1], strides = [1, 1]} : vector<32x9xf32> to vector<32x1xf32>
    %75 = vector.broadcast %74 : vector<32x1xf32> to vector<32x256xf32>
    %76 = arith.mulf %75, %73 : vector<32x256xf32>
    %77 = arith.addf %70, %76 : vector<32x256xf32>
    %c15_i32 = arith.constant 15 : i32
    %78 = tpu.dynamic_rotate %6 by %c15_i32 dim 1 : vector<32x256xf32>, i32 -> vector<32x256xf32>
    %cst_23 = arith.constant 0.000000e+00 : f32
    %79 = vector.broadcast %cst_23 : f32 to vector<32x256xf32>
    %80 = arith.select %34, %78, %79 : vector<32x256xi1>, vector<32x256xf32>
    %81 = vector.extract_strided_slice %32 {offsets = [0, 2], sizes = [32, 1], strides = [1, 1]} : vector<32x9xf32> to vector<32x1xf32>
    %82 = vector.broadcast %81 : vector<32x1xf32> to vector<32x256xf32>
    %83 = arith.mulf %82, %80 : vector<32x256xf32>
    %84 = arith.addf %77, %83 : vector<32x256xf32>
    %c241_i32 = arith.constant 241 : i32
    %85 = tpu.dynamic_rotate %6 by %c241_i32 dim 1 : vector<32x256xf32>, i32 -> vector<32x256xf32>
    %cst_24 = arith.constant 0.000000e+00 : f32
    %86 = vector.broadcast %cst_24 : f32 to vector<32x256xf32>
    %87 = arith.select %35, %85, %86 : vector<32x256xi1>, vector<32x256xf32>
    %88 = vector.extract_strided_slice %32 {offsets = [0, 6], sizes = [32, 1], strides = [1, 1]} : vector<32x9xf32> to vector<32x1xf32>
    %89 = vector.broadcast %88 : vector<32x1xf32> to vector<32x256xf32>
    %90 = arith.mulf %89, %87 : vector<32x256xf32>
    %91 = arith.addf %84, %90 : vector<32x256xf32>
    %c239_i32 = arith.constant 239 : i32
    %92 = tpu.dynamic_rotate %6 by %c239_i32 dim 1 : vector<32x256xf32>, i32 -> vector<32x256xf32>
    %cst_25 = arith.constant 0.000000e+00 : f32
    %93 = vector.broadcast %cst_25 : f32 to vector<32x256xf32>
    %94 = arith.select %36, %92, %93 : vector<32x256xi1>, vector<32x256xf32>
    %95 = vector.extract_strided_slice %32 {offsets = [0, 8], sizes = [32, 1], strides = [1, 1]} : vector<32x9xf32> to vector<32x1xf32>
    %96 = vector.broadcast %95 : vector<32x1xf32> to vector<32x256xf32>
    %97 = arith.mulf %96, %94 : vector<32x256xf32>
    %98 = arith.addf %91, %97 : vector<32x256xf32>
    %cst_26 = arith.constant 5.000000e-01 : f32
    %99 = vector.broadcast %cst_26 : f32 to vector<32x256xf32>
    %100 = arith.mulf %99, %98 : vector<32x256xf32>
    %cst_27 = arith.constant 0.707106769 : f32
    %101 = vector.broadcast %cst_27 : f32 to vector<32x256xf32>
    %102 = arith.mulf %98, %101 : vector<32x256xf32>
    %103 = math.absf %102 : vector<32x256xf32>
    %cst_28 = arith.constant 0.327591091 : f32
    %104 = vector.broadcast %cst_28 : f32 to vector<32x256xf32>
    %105 = arith.mulf %104, %103 : vector<32x256xf32>
    %cst_29 = arith.constant 1.000000e+00 : f32
    %106 = vector.broadcast %cst_29 : f32 to vector<32x256xf32>
    %107 = arith.addf %106, %105 : vector<32x256xf32>
    %108 = tpu.reciprocal %107 {approx = true} : vector<32x256xf32> -> vector<32x256xf32>
    %cst_30 = arith.constant 1.06140542 : f32
    %109 = vector.broadcast %cst_30 : f32 to vector<32x256xf32>
    %110 = arith.mulf %109, %108 : vector<32x256xf32>
    %cst_31 = arith.constant -1.45315206 : f32
    %111 = vector.broadcast %cst_31 : f32 to vector<32x256xf32>
    %112 = arith.addf %110, %111 : vector<32x256xf32>
    %113 = arith.mulf %112, %108 : vector<32x256xf32>
    %cst_32 = arith.constant 1.42141378 : f32
    %114 = vector.broadcast %cst_32 : f32 to vector<32x256xf32>
    %115 = arith.addf %113, %114 : vector<32x256xf32>
    %116 = arith.mulf %115, %108 : vector<32x256xf32>
    %cst_33 = arith.constant -0.284496725 : f32
    %117 = vector.broadcast %cst_33 : f32 to vector<32x256xf32>
    %118 = arith.addf %116, %117 : vector<32x256xf32>
    %119 = arith.mulf %118, %108 : vector<32x256xf32>
    %cst_34 = arith.constant 0.254829586 : f32
    %120 = vector.broadcast %cst_34 : f32 to vector<32x256xf32>
    %121 = arith.addf %119, %120 : vector<32x256xf32>
    %122 = arith.mulf %121, %108 : vector<32x256xf32>
    %cst_35 = arith.constant 0.000000e+00 : f32
    %123 = vector.broadcast %cst_35 : f32 to vector<32x256xf32>
    %124 = arith.subf %123, %103 : vector<32x256xf32>
    %125 = arith.mulf %124, %103 : vector<32x256xf32>
    %126 = math.exp %125 : vector<32x256xf32>
    %127 = arith.mulf %122, %126 : vector<32x256xf32>
    %cst_36 = arith.constant 1.000000e+00 : f32
    %128 = vector.broadcast %cst_36 : f32 to vector<32x256xf32>
    %129 = arith.subf %128, %127 : vector<32x256xf32>
    %cst_37 = arith.constant 0.000000e+00 : f32
    %130 = vector.broadcast %cst_37 : f32 to vector<32x256xf32>
    %131 = arith.cmpf oge, %102, %130 : vector<32x256xf32>
    %cst_38 = arith.constant 0.000000e+00 : f32
    %132 = vector.broadcast %cst_38 : f32 to vector<32x256xf32>
    %133 = arith.subf %132, %129 : vector<32x256xf32>
    %134 = arith.select %131, %129, %133 : vector<32x256xi1>, vector<32x256xf32>
    %cst_39 = arith.constant 1.000000e+00 : f32
    %135 = vector.broadcast %cst_39 : f32 to vector<32x256xf32>
    %136 = arith.addf %135, %134 : vector<32x256xf32>
    %137 = arith.mulf %100, %136 : vector<32x256xf32>
    %c0_40 = arith.constant 0 : index
    %c0_41 = arith.constant 0 : index
    %138 = vector.load %arg6[%c0_40, %c0_41] : memref<4x32xf32, #tpu.memory_space<vmem>>, vector<4x32xf32>
    %cst_42 = arith.constant dense<0.000000e+00> : vector<4x256xf32>
    %139 = tpu.matmul %138, %137, %cst_42 {dimension_numbers = #tpu.dot_dimension_numbers<[1], [0], [0], [1], [0, 0, 1, 1], [], []>} : vector<4x32xf32>, vector<32x256xf32>, vector<4x256xf32> -> vector<4x256xf32>
    %c0_43 = arith.constant 0 : index
    %c0_44 = arith.constant 0 : index
    %140 = vector.load %arg7[%c0_43, %c0_44] : memref<4x1xf32, #tpu.memory_space<vmem>>, vector<4x1xf32>
    %141 = vector.broadcast %140 : vector<4x1xf32> to vector<4x256xf32>
    %142 = arith.addf %139, %141 : vector<4x256xf32>
    %c0_45 = arith.constant 0 : index
    %c0_46 = arith.constant 0 : index
    %c0_47 = arith.constant 0 : index
    %143 = vector.load %arg8[%c0_45, %c0_46, %c0_47] : memref<1x4x256xf32, #tpu.memory_space<vmem>>, vector<1x4x256xf32>
    %144 = vector.shape_cast %143 : vector<1x4x256xf32> to vector<4x256xf32>
    %145 = vector.shape_cast %142 : vector<4x256xf32> to vector<1x4x256xf32>
    tpu.vector_store %arg8[%c0_45, %c0_46, %c0_47], %145 {strides = array<i32>} : memref<1x4x256xf32, #tpu.memory_space<vmem>>, vector<1x4x256xf32>,
    return
  }
  func.func @transform_0(%arg0: i32) -> (i32, i32, i32) {
    %c0_i32 = arith.constant 0 : i32
    %c0_i32_0 = arith.constant 0 : i32
    %c0_i32_1 = arith.constant 0 : i32
    return %arg0, %c0_i32, %c0_i32_0 : i32, i32, i32
  }
  func.func @transform_1(%arg0: i32) -> (i32, i32) {
    %c0_i32 = arith.constant 0 : i32
    %c0_i32_0 = arith.constant 0 : i32
    %c0_i32_1 = arith.constant 0 : i32
    return %c0_i32, %c0_i32_0 : i32, i32
  }
  func.func @transform_2(%arg0: i32) -> (i32, i32) {
    %c0_i32 = arith.constant 0 : i32
    %c0_i32_0 = arith.constant 0 : i32
    %c0_i32_1 = arith.constant 0 : i32
    return %c0_i32, %c0_i32_0 : i32, i32
  }
  func.func @transform_3(%arg0: i32) -> (i32, i32) {
    %c0_i32 = arith.constant 0 : i32
    %c0_i32_0 = arith.constant 0 : i32
    %c0_i32_1 = arith.constant 0 : i32
    return %c0_i32, %c0_i32_0 : i32, i32
  }
  func.func @transform_4(%arg0: i32) -> (i32, i32) {
    %c0_i32 = arith.constant 0 : i32
    %c0_i32_0 = arith.constant 0 : i32
    %c0_i32_1 = arith.constant 0 : i32
    return %c0_i32, %c0_i32_0 : i32, i32
  }
  func.func @transform_5(%arg0: i32) -> (i32, i32) {
    %c0_i32 = arith.constant 0 : i32
    %c0_i32_0 = arith.constant 0 : i32
    %c0_i32_1 = arith.constant 0 : i32
    return %c0_i32, %c0_i32_0 : i32, i32
  }
  func.func @transform_6(%arg0: i32) -> (i32, i32) {
    %c0_i32 = arith.constant 0 : i32
    %c0_i32_0 = arith.constant 0 : i32
    %c0_i32_1 = arith.constant 0 : i32
    return %c0_i32, %c0_i32_0 : i32, i32
  }
  func.func @transform_7(%arg0: i32) -> (i32, i32, i32) {
    %c0_i32 = arith.constant 0 : i32
    %c0_i32_0 = arith.constant 0 : i32
    %c0_i32_1 = arith.constant 0 : i32
    return %arg0, %c0_i32, %c0_i32_0 : i32, i32, i32
  }
}

</mosaic_0001>

<bundles_post_ra>
// kernel: mlp_pallas.1
= control target key start
LH: loop header
LB: loop body
LE: loop exit
PB: predicated region body
PF: predicated region fallthrough
CT: control target
= control target key end

     0   :  { %s1568_s24 = smov 0   ;;  %s2537_s0 = inlined_call_operand.vmem [shape: f32[2,4,256], index: 0, kind: input, shape index: {}]   ;;  %s2538_s1 = inlined_call_operand.vmem [shape: f32[32,4], index: 1, kind: input, shape index: {}]   ;;  %s2539_s2 = inlined_call_operand.vmem [shape: f32[32,1], index: 2, kind: input, shape index: {}]   ;;  %s2540_s3 = inlined_call_operand.vmem [shape: f32[32,9], index: 3, kind: input, shape index: {}]   ;;  %s2541_s4 = inlined_call_operand.vmem [shape: f32[32,1], index: 4, kind: input, shape index: {}]   ;;  %s2542_s5 = inlined_call_operand.vmem [shape: f32[4,32], index: 5, kind: input, shape index: {}]   ;;  %s2543_s6 = inlined_call_operand.vmem [shape: f32[4,1], index: 6, kind: input, shape index: {}]   ;;  %s2544_s7 = inlined_call_operand.vmem [shape: f32[2,4,256], index: 7, kind: output, shape index: {}]  }
   0x1 LB: > { %s1394_s25 = sadd.s32 4294967295, %s1508_s24   ;;  %p1398_p0 = scmp.ge.s32.totalorder %s1508_s24, 1  ;;  %s1508_s24 = sphi %s1568_s24, %s17_s24  }
   0x2   : > { %p237_p1 = scmp.lt.s32.totalorder %s1508_s24, 3 }
   0x4   : > { %p238_p2 = pnand %p1398_p0, %p237_p1 }
   0x6   : > { %241 = sbr.rel (%p238_p2) target bundleno = 745 (0x2e9), region = 48 }
   0xb   : > { %p269_p3 = scmp.lt.s32.totalorder %s1394_s25, 1  ;;  %v1510_v0 = vmov 0.0   ;;  %v1579_v1 = vld [vmem:[%s2540_s3 + $0x18] sm:$0xff]  ;;  %v1511_v2 = vmov 4   ;;  %v1512_v3 = vmov 0   ;;  %v285_v4 = vld [vmem:[%s2539_s2 + $0x8] sm:$0xff] }
   0xc   : > { %392 = vmatprep.mubr.f32.mxu0 %v1510_v0  ;;  %1327 = vmatprep.mubr.f32.mxu1 %v1510_v0  ;;  %v1592_v5 = vld [vmem:[%s2540_s3] sm:$0xff]  ;;  %vm323_vm0 = vcmask 1043456   ;;  %vm310_vm1 = vcmask 31744   ;;  %v1513_v10 = vmov 3   ;;  %v280_v11 = vld [vmem:[%s2538_s1 + $0x8] sm:$0xff]  ;;  %v1614_v12 = vld [vmem:[%s2540_s3 + $0x10] sm:$0xff] }
   0xd   : > { %s2593_s25 = smov (!%p269_p3, %s1394_s25), 1  ;;  %1441 = vset.pattern.permute.xlu0 %v1511_v2  ;;  %1440 = vset.pattern.permute.xlu1 %v1512_v3  ;;  %v284_v6 = vld [vmem:[%s2539_s2] sm:$0xff]  ;;  %v281_v13 = vld [vmem:[%s2538_s1 + $0x10] sm:$0xff]  ;;  %v495_v14 = vld [vmem:[%s2541_s4 + $0x18] sm:$0xff]  ;;  %v1514_v17 = vmov 7   ;;  %v1515_v19 = vmov 5  }
   0xe   : > { %481 = vperm.xlu0 %1441, %v1579_v1   ;;  %295 = vperm.xlu1 %1440, %v285_v4   ;;  %s1412_s30 = sshll.u32 %s2593_s25, 3  ;;  %v279_v9 = vld [vmem:[%s2538_s1] sm:$0xff]  ;;  %v282_v15 = vld [vmem:[%s2538_s1 + $0x18] sm:$0xff]  ;;  %v1634_v16 = vld [vmem:[%s2540_s3 + $0x8] sm:$0xff]  ;;  %v1516_v21 = vmov 1   ;;  %v1517_v22 = vmov 8  }
   0xf   : > { %s273_s14 = scalar_lea.vmem %s2537_s0, %s1412_s30  ;;  %v494_v18 = vld [vmem:[%s2541_s4 + $0x10] sm:$0xff]  ;;  %v493_v20 = vld [vmem:[%s2541_s4 + $0x8] sm:$0xff]  ;;  %v492_v23 = vld [vmem:[%s2541_s4] sm:$0xff]  ;;  %v1518_v24 = vmov 2   ;;  %v1519_v25 = vmov 6   ;;  %s1520_s19 = smov 127  }
  0x10   : > { %v283_v7 = vld [vmem:[%s273_s14] sm:$0xff]  ;;  %v287_v26 = vld [vmem:[%s2539_s2 + $0x18] sm:$0xff]  ;;  %v286_v27 = vld [vmem:[%s2539_s2 + $0x10] sm:$0xff]  ;;  %s1521_s20 = smov 1   ;;  %s1522_s21 = smov 112  }
  0x11   : > { %v309_v8 = vcombine.high %v283_v7, %v283_v7  ;;  %s1523_s22 = smov 16   ;;  %s1524_s23 = smov 15  }
  0x12   : > { %466 = vperm.xlu0 %1441, %v1592_v5   ;;  %290 = vperm.xlu1 %1440, %v284_v6   ;;  %s1525_s26 = smov 17   ;;  %s1526_s27 = smov 113  }
  0x13   : > { %1403 = vmatprep.subr.msk.mxu0 %vm323_vm0, %v309_v8  ;;  %s1527_s28 = smov 111   ;;  %s278_s13 = scalar_lea.vmem %s2544_s7, %s1412_s30 }
  0x14   : > { %1404 = vmatpush1.msk.msra.mxu0 %vm323_vm0, %v283_v7 }
  0x15   : > { %1405 = vmatmul.mubr.msk.f32.vlgmr.msra.gmra.mxu0 %vm310_vm1, %v279_v9 }
  0x16   : > { %1447 = vset.pattern.permute.xlu0 %v1513_v10  ;;  %398 = vmatprep.mubr.f32.mxu0 %v1510_v0 }
  0x17   : > { %570 = vperm.xlu0 %1447, %v1579_v1   ;;  %1442 = vset.pattern.permute.xlu1 %v1511_v2 }
  0x18   : > { %476 = vperm.xlu1 %1442, %v1614_v12  }
  0x19   : > { %1406 = vmatmul.mubr.msk.f32.gmra.mxu0 %vm310_vm1, %v280_v11 }
  0x1a   : > { %404 = vmatprep.mubr.f32.mxu0 %v1510_v0 }
  0x1b   : > { %566 = vperm.xlu0 %1447, %v1614_v12  }
  0x1c   : > { %1443 = vset.pattern.permute.xlu1 %v1512_v3 }
  0x1d   : > { %1407 = vmatmul.mubr.msk.f32.gmra.mxu0 %vm310_vm1, %v281_v13  ;;  %513 = vperm.xlu1 %1443, %v495_v14  }
  0x1e   : > { %410 = vmatprep.mubr.f32.mxu0 %v1510_v0 }
  0x1f   : > { %558 = vperm.xlu0 %1447, %v1592_v5  }
  0x21   : > { %1408 = vmatmul.mubr.msk.f32.gmra.mxu0 %vm310_vm1, %v282_v15  ;;  %1444 = vset.pattern.permute.xlu1 %v1511_v2 }
  0x22   : > { %471 = vperm.xlu1 %1444, %v1634_v16  }
  0x23   : > { %1454 = vset.pattern.permute.xlu0 %v1514_v17 }
  0x24   : > { %765 = vperm.xlu0 %1454, %v1579_v1  }
  0x26   : > { %1445 = vset.pattern.permute.xlu1 %v1512_v3 }
  0x27   : > { %508 = vperm.xlu1 %1445, %v494_v18  }
  0x28   : > { %1455 = vset.pattern.permute.xlu0 %v1515_v19 }
  0x29   : > { %631 = vperm.xlu0 %1455, %v1614_v12  }
  0x2b   : > { %1446 = vset.pattern.permute.xlu1 %v1515_v19 }
  0x2c   : > { %635 = vperm.xlu1 %1446, %v1579_v1  }
  0x2d   : > { %623 = vperm.xlu0 %1455, %v1592_v5  }
  0x30   : > { %1448 = vset.pattern.permute.xlu1 %v1512_v3 }
  0x31   : > { %1456 = vset.pattern.permute.xlu0 %v1516_v21  ;;  %503 = vperm.xlu1 %1448, %v493_v20  }
  0x32   : > { %692 = vperm.xlu0 %1456, %v1634_v16  }
  0x35   : > { %1449 = vset.pattern.permute.xlu1 %v1513_v10 }
  0x36   : > { %688 = vperm.xlu0 %1456, %v1592_v5   ;;  %562 = vperm.xlu1 %1449, %v1634_v16  }
  0x3a   : > { %1464 = vset.pattern.permute.xlu0 %v1517_v22  ;;  %1450 = vset.pattern.permute.xlu1 %v1516_v21 }
  0x3b   : > { %1025 = vperm.xlu0 %1464, %v1579_v1   ;;  %700 = vperm.xlu1 %1450, %v1579_v1  }
  0x3f   : > { %1465 = vset.pattern.permute.xlu0 %v1518_v24  ;;  %1451 = vset.pattern.permute.xlu1 %v1512_v3 }
  0x40   : > { %883 = vperm.xlu0 %1465, %v1592_v5   ;;  %498 = vperm.xlu1 %1451, %v492_v23   ;;  %v1253_v23 = vld [vmem:[%s2543_s6] sm:$0xf] }
  0x44   : > { %1466 = vset.pattern.permute.xlu0 %v1519_v25  ;;  %1452 = vset.pattern.permute.xlu1 %v1515_v19 }
  0x45   : > { %960 = vperm.xlu0 %1466, %v1579_v1   ;;  %627 = vperm.xlu1 %1452, %v1634_v16  }
  0x49   : > { %948 = vperm.xlu0 %1466, %v1592_v5   ;;  %1453 = vset.pattern.permute.xlu1 %v1516_v21 }
  0x4a   : > { %696 = vperm.xlu1 %1453, %v1614_v12  }
  0x4d   : > { %1468 = vset.pattern.permute.xlu0 %v1512_v3 }
  0x4e   : > { %305 = vperm.xlu0 %1468, %v287_v26   ;;  %1457 = vset.pattern.permute.xlu1 %v1514_v17 }
  0x4f   : > { %761 = vperm.xlu1 %1457, %v1614_v12  }
  0x52   : > { %300 = vperm.xlu0 %1468, %v286_v27  }
  0x53   : > { %1458 = vset.pattern.permute.xlu1 %v1512_v3 }
  0x54   : > { %830 = vperm.xlu1 %1458, %v1579_v1  }
  0x56   : > { %826 = vperm.xlu0 %1468, %v1614_v12  }
  0x58   : > { %1459 = vset.pattern.permute.xlu1 %v1514_v17 }
  0x59   : > { %757 = vperm.xlu1 %1459, %v1634_v16  }
  0x5a   : > { %822 = vperm.xlu0 %1468, %v1634_v16  }
  0x5d   : > { %1460 = vset.pattern.permute.xlu1 %v1518_v24 }
  0x5e   : > { %818 = vperm.xlu0 %1468, %v1592_v5   ;;  %895 = vperm.xlu1 %1460, %v1579_v1  }
  0x62   : > { %1461 = vset.pattern.permute.xlu1 %v1514_v17 }
  0x63   : > { %753 = vperm.xlu1 %1461, %v1592_v5  }
  0x67   : > { %1462 = vset.pattern.permute.xlu1 %v1518_v24  ;;  %v417_v24 = vlaneseq }
  0x68   : > { %891 = vperm.xlu1 %1462, %v1614_v12  }
  0x69   : > { %v1897_v26 = vand.u32 127, %v417_v24 }
  0x6b   : > { %vm540_vm3 = vcmp.lt.s32.totalorder %v1897_v26, 1  ;;  %vm605_vm4 = vcmp.lt.s32.totalorder %v1897_v26, 127  ;;  %vm448_vm8 = vcmp.ge.s32.totalorder %v1897_v26, 16  ;;  %vm670_vm9 = vcmp.lt.s32.totalorder %v1897_v26, 16 }
  0x6c   : > { %887 = vperm.xlu1 %1462, %v1634_v16   ;;  %vm865_vm10 = vcmp.lt.s32.totalorder %v1897_v26, 15  ;;  %vm735_vm11 = vcmp.lt.s32.totalorder %v1897_v26, 112  ;;  %vm800_vm14 = vcmp.lt.s32.totalorder %v1897_v26, 17  ;;  %vm930_vm0 = vcmp.lt.s32.totalorder %v1897_v26, 113 }
  0x70   : > { %1463 = vset.pattern.permute.xlu1 %v1519_v25 }
  0x71   : > { %956 = vperm.xlu1 %1463, %v1614_v12  }
  0x75   : > { %952 = vperm.xlu1 %1463, %v1634_v16  }
  0x79   : > { %1467 = vset.pattern.permute.xlu1 %v1517_v22 }
  0x7a   : > { %1021 = vperm.xlu1 %1467, %v1614_v12  }
  0x7e   : > { %1017 = vperm.xlu1 %1467, %v1634_v16  }
  0x89   : > { %v1686_v28 = vpop.permute.xlu0 %481  ;;  %v296_v33 = vpop.permute.xlu1 %295 }
  0x8d   : > { %v1688_v29 = vpop.permute.xlu0 %466  ;;  %v291_v35 = vpop.permute.xlu1 %290 }
  0x92   : > { %v1690_v30 = vpop.permute.xlu0 %570 }
  0x93   : > { %v1700_v37 = vpop.permute.xlu1 %476 }
  0x96   : > { %v1692_v31 = vpop.permute.xlu0 %566 }
  0x98   : > { %v1704_v39 = vpop.permute.xlu1 %513 }
  0x9a   : > { %v1694_v32 = vpop.permute.xlu0 %558 }
  0x9d   : > { %v1708_v41 = vpop.permute.xlu1 %471 }
  0x9f   : > { %v1696_v34 = vpop.permute.xlu0 %765 }
  0xa2   : > { %v1718_v45 = vpop.permute.xlu1 %508 }
  0xa4   : > { %v1698_v36 = vpop.permute.xlu0 %631 }
  0xa7   : > { %v1726_v48 = vpop.permute.xlu1 %635 }
  0xa8   : > { %v1702_v38 = vpop.permute.xlu0 %623 }
  0xac   : > { %v1740_v51 = vpop.permute.xlu1 %503 }
  0xad   : > { %v1706_v40 = vpop.permute.xlu0 %692 }
  0xb1   : > { %v1710_v42 = vpop.permute.xlu0 %688  ;;  %v1750_v55 = vpop.permute.xlu1 %562 }
  0xb6   : > { %v1720_v46 = vpop.permute.xlu0 %1025  ;;  %v1762_v57 = vpop.permute.xlu1 %700 }
  0xb7   : > { %2554 = vst [vmem:[#allocation2_spill] sm:$0xff] %v1720_v46 }
  0xbb   : > { %v1732_v49 = vpop.permute.xlu0 %883  ;;  %v1770_v62 = vpop.permute.xlu1 %498 }
  0xc0   : > { %v1742_v52 = vpop.permute.xlu0 %960  ;;  %v1782_v1 = vpop.permute.xlu1 %627 }
  0xc1   : > { %2555 = vst [vmem:[#allocation3_spill] sm:$0xff] %v1742_v52 }
  0xc4   : > { %v1756_v56 = vpop.permute.xlu0 %948 }
  0xc5   : > { %2556 = vst [vmem:[#allocation4_spill] sm:$0xff] %v1756_v56  ;;  %v1788_v2 = vpop.permute.xlu1 %696 }
  0xc9   : > { %v306_v59 = vpop.permute.xlu0 %305 }
  0xca   : > { %v1798_v3 = vpop.permute.xlu1 %761 }
  0xcd   : > { %v301_v61 = vpop.permute.xlu0 %300 }
  0xcf   : > { %v1806_v7 = vpop.permute.xlu1 %830 }
  0xd1   : > { %v1870_v19 = vpop.permute.xlu0 %826 }
  0xd4   : > { %v1816_v9 = vpop.permute.xlu1 %757 }
  0xd5   : > { %v394_v43 = vpop.f32.mrf.mxu0  ;;  %v1878_v21 = vpop.permute.xlu0 %822 }
  0xd6   : > { %v1712_v44 = vadd.f32 %v394_v43, %v291_v35 }
  0xd7   : > { %v396_v47 = vpop.f32.mrf.mxu0 }
  0xd8   : > { %589 = vrot.lane.b32.xlu1 %v1712_v44, %s1520_s19  ;;  %524 = vrot.lane.b32.xlu0 %v1712_v44, %s1521_s20  ;;  %v1734_v50 = vadd.f32 %v396_v47, %v291_v35  ;;  %v1902_v35 = vadd.s32 128, %v1897_v26 }
  0xd9   : > { %v400_v53 = vpop.f32.mrf.mxu0  ;;  %v1824_v11 = vpop.permute.xlu1 %895 }
  0xda   : > { %v1748_v54 = vadd.f32 %v400_v53, %v296_v33  ;;  %2557 = vst [vmem:[#allocation5_spill] sm:$0xff] %v1824_v11  ;;  %v1893_v25 = vpop.permute.xlu0 %818  ;;  %v424_v53 = vand.u32 15, %v1897_v26  ;;  %vm451_vm12 = vcmp.lt.s32.totalorder %v1902_v35, 240 }
  0xdb   : > { %v402_v58 = vpop.f32.mrf.mxu0 }
  0xdc   : > { %719 = vrot.lane.b32.xlu1 %v1712_v44, %s1522_s21  ;;  %654 = vrot.lane.b32.xlu0 %v1712_v44, %s1523_s22  ;;  %v1768_v60 = vadd.f32 %v402_v58, %v296_v33  ;;  %v431_v58 = vand.u32 15, %v1902_v35  ;;  %vm1914_vm2 = vcmp.ge.s32.totalorder %v424_v53, 1  ;;  %vm1926_vm6 = vcmp.le.s32.totalorder %v424_v53, 14 }
  0xdd   : > { %v406_v63 = vpop.f32.mrf.mxu0  ;;  %vm1982_vm13 = vmand %vm448_vm8, %vm1926_vm6 }
  0xde   : > { %v1776_v0 = vadd.f32 %v406_v63, %v301_v61  ;;  %v1834_v12 = vpop.permute.xlu1 %753  ;;  %vm1922_vm5 = vcmp.ge.s32.totalorder %v431_v58, 1  ;;  %vm1930_vm7 = vcmp.le.s32.totalorder %v431_v58, 14  ;;  %vm1998_vm15 = vmand %vm448_vm8, %vm1914_vm2 }
  0xdf   : > { %v408_v4 = vpop.f32.mrf.mxu0  ;;  %vm2136_vm1 = vmand %vm451_vm12, %vm1922_vm5 }
  0xe0   : > { %849 = vrot.lane.b32.xlu1 %v1712_v44, %s1524_s23  ;;  %784 = vrot.lane.b32.xlu0 %v1712_v44, %s1525_s26  ;;  %v1804_v6 = vadd.f32 %v408_v4, %v301_v61 }
  0xe1   : > { %v412_v8 = vpop.f32.mrf.mxu0 }
  0xe2   : > { %v1818_v10 = vadd.f32 %v412_v8, %v306_v59  ;;  %v485_v8 = vmul.f32 %v1688_v29, %v1734_v50 }
  0xe3   : > { %v1840_v13 = vpop.permute.xlu1 %891  ;;  %v414_v14 = vpop.f32.mrf.mxu0 }
  0xe4   : > { %532 = vrot.lane.b32.xlu1 %v1734_v50, %s1521_s20  ;;  %597 = vrot.lane.b32.xlu0 %v1734_v50, %s1520_s19  ;;  %2558 = vst [vmem:[#allocation6_spill] sm:$0xff] %v1840_v13  ;;  %v1846_v15 = vadd.f32 %v414_v14, %v306_v59  ;;  %v484_v59 = vmul.f32 %v1688_v29, %v1712_v44 }
  0xe6   : > { %v516_v24 = vadd.f32 %v1770_v62, %v484_v59 }
  0xe7   : > { %v1852_v16 = vpop.permute.xlu1 %887 }
  0xe8   : > { %662 = vrot.lane.b32.xlu1 %v1734_v50, %s1523_s22  ;;  %857 = vrot.lane.b32.xlu0 %v1734_v50, %s1524_s23 }
  0xec   : > { %727 = vrot.lane.b32.xlu1 %v1734_v50, %s1522_s21  ;;  %591 = vrot.lane.b32.xlu0 %v1748_v54, %s1520_s19  ;;  %v1858_v17 = vpop.permute.xlu1 %956 }
  0xed   : > { %2559 = vst [vmem:[#allocation7_spill] sm:$0xff] %v1858_v17 }
  0xf0   : > { %792 = vrot.lane.b32.xlu1 %v1734_v50, %s1525_s26  ;;  %786 = vrot.lane.b32.xlu0 %v1748_v54, %s1525_s26  ;;  %v1868_v18 = vpop.permute.xlu1 %952 }
  0xf4   : > { %526 = vrot.lane.b32.xlu1 %v1748_v54, %s1521_s20  ;;  %851 = vrot.lane.b32.xlu0 %v1748_v54, %s1524_s23 }
  0xf5   : > { %v1876_v20 = vpop.permute.xlu1 %1021 }
  0xf6   : > { %2560 = vst [vmem:[#allocation8_spill] sm:$0xff] %v1876_v20 }
  0xf8   : > { %656 = vrot.lane.b32.xlu1 %v1748_v54, %s1523_s22  ;;  %664 = vrot.lane.b32.xlu0 %v1768_v60, %s1523_s22 }
  0xf9   : > { %v1888_v22 = vpop.permute.xlu1 %1017 }
  0xfa   : > { %2561 = vst [vmem:[#allocation9_spill] sm:$0xff] %v1888_v22 }
  0xfc   : > { %721 = vrot.lane.b32.xlu1 %v1748_v54, %s1522_s21  ;;  %593 = vrot.lane.b32.xlu0 %v1776_v0, %s1520_s19 }
 0x100   : > { %916 = vrot.lane.b32.xlu1 %v1748_v54, %s1526_s27  ;;  %658 = vrot.lane.b32.xlu0 %v1776_v0, %s1523_s22 }
 0x104   : > { %534 = vrot.lane.b32.xlu1 %v1768_v60, %s1521_s20  ;;  %788 = vrot.lane.b32.xlu0 %v1776_v0, %s1525_s26 }
 0x108   : > { %599 = vrot.lane.b32.xlu1 %v1768_v60, %s1520_s19  ;;  %853 = vrot.lane.b32.xlu0 %v1776_v0, %s1524_s23 }
 0x10c   : > { %729 = vrot.lane.b32.xlu1 %v1768_v60, %s1522_s21  ;;  %918 = vrot.lane.b32.xlu0 %v1776_v0, %s1526_s27 }
 0x110   : > { %794 = vrot.lane.b32.xlu1 %v1768_v60, %s1525_s26  ;;  %536 = vrot.lane.b32.xlu0 %v1804_v6, %s1521_s20 }
 0x114   : > { %859 = vrot.lane.b32.xlu1 %v1768_v60, %s1524_s23  ;;  %731 = vrot.lane.b32.xlu0 %v1804_v6, %s1522_s21 }
 0x118   : > { %528 = vrot.lane.b32.xlu1 %v1776_v0, %s1521_s20  ;;  %530 = vrot.lane.b32.xlu0 %v1818_v10, %s1521_s20 }
 0x11c   : > { %723 = vrot.lane.b32.xlu1 %v1776_v0, %s1522_s21  ;;  %725 = vrot.lane.b32.xlu0 %v1818_v10, %s1522_s21 }
 0x120   : > { %601 = vrot.lane.b32.xlu1 %v1804_v6, %s1520_s19  ;;  %855 = vrot.lane.b32.xlu0 %v1818_v10, %s1524_s23 }
 0x124   : > { %666 = vrot.lane.b32.xlu1 %v1804_v6, %s1523_s22  ;;  %920 = vrot.lane.b32.xlu0 %v1818_v10, %s1526_s27 }
 0x128   : > { %796 = vrot.lane.b32.xlu1 %v1804_v6, %s1525_s26  ;;  %985 = vrot.lane.b32.xlu0 %v1818_v10, %s1527_s28 }
 0x12c   : > { %861 = vrot.lane.b32.xlu1 %v1804_v6, %s1524_s23  ;;  %603 = vrot.lane.b32.xlu0 %v1846_v15, %s1520_s19 }
 0x130   : > { %926 = vrot.lane.b32.xlu1 %v1804_v6, %s1526_s27  ;;  %798 = vrot.lane.b32.xlu0 %v1846_v15, %s1525_s26 }
 0x134   : > { %595 = vrot.lane.b32.xlu1 %v1818_v10, %s1520_s19  ;;  %924 = vrot.lane.b32.xlu0 %v1768_v60, %s1526_s27 }
 0x138   : > { %660 = vrot.lane.b32.xlu1 %v1818_v10, %s1523_s22  ;;  %991 = vrot.lane.b32.xlu0 %v1804_v6, %s1527_s28 }
 0x13c   : > { %790 = vrot.lane.b32.xlu1 %v1818_v10, %s1525_s26  ;;  %914 = vrot.lane.b32.xlu0 %v1712_v44, %s1526_s27 }
 0x140   : > { %538 = vrot.lane.b32.xlu1 %v1846_v15, %s1521_s20  ;;  %981 = vrot.lane.b32.xlu0 %v1748_v54, %s1527_s28 }
 0x144   : > { %668 = vrot.lane.b32.xlu1 %v1846_v15, %s1523_s22  ;;  %979 = vrot.lane.b32.xlu0 %v1712_v44, %s1527_s28 }
 0x148   : > { %733 = vrot.lane.b32.xlu1 %v1846_v15, %s1522_s21  ;;  %1256 = vperm.xlu0 %1468, %v1253_v23   ;;  %v2585_v23 = vld [vmem:[#allocation7_spill] sm:$0xff] }
 0x14a   : > { %v590_v27 = vpop.permute.xlu1 %589  ;;  %v525_v33 = vpop.permute.xlu0 %524 }
 0x14c   : > { %863 = vrot.lane.b32.xlu1 %v1846_v15, %s1524_s23 }
 0x14e   : > { %v720_v43 = vpop.permute.xlu1 %719  ;;  %v655_v47 = vpop.permute.xlu0 %654 }
 0x150   : > { %928 = vrot.lane.b32.xlu1 %v1846_v15, %s1526_s27 }
 0x152   : > { %v850_v61 = vpop.permute.xlu1 %849  ;;  %v1910_v63 = vpop.permute.xlu0 %784 }
 0x154   : > { %993 = vrot.lane.b32.xlu1 %v1846_v15, %s1527_s28 }
 0x156   : > { %v533_v22 = vpop.permute.xlu1 %532  ;;  %v598_v56 = vpop.permute.xlu0 %597 }
 0x157   : > { %v541_v29 = vsel %vm540_vm3, %v525_v33, %v533_v22  ;;  %v545_v53 = vsel %vm540_vm3, %v533_v22, %v525_v33  ;;  %v606_v58 = vsel %vm605_vm4, %v590_v27, %v598_v56  ;;  %v610_v20 = vsel %vm605_vm4, %v598_v56, %v590_v27 }
 0x158   : > { %v549_v59 = vsel %vm1914_vm2, %v545_v53, 0.0  ;;  %v550_v46 = vsel %vm1922_vm5, %v541_v29, 0.0  ;;  %v614_v17 = vsel %vm1926_vm6, %v606_v58, 0.0  ;;  %v615_v13 = vsel %vm1930_vm7, %v610_v20, 0.0  ;;  %983 = vrot.lane.b32.xlu1 %v1776_v0, %s1527_s28 }
 0x159   : > { %v517_v22 = vadd.f32 %v1770_v62, %v485_v8  ;;  %v573_v33 = vmul.f32 %v1694_v32, %v549_v59  ;;  %v574_v56 = vmul.f32 %v1694_v32, %v550_v46  ;;  %v638_v27 = vmul.f32 %v1702_v38, %v614_v17 }
 0x15a   : > { %v639_v29 = vmul.f32 %v1702_v38, %v615_v13  ;;  %v663_v53 = vpop.permute.xlu1 %662  ;;  %v858_v58 = vpop.permute.xlu0 %857 }
 0x15b   : > { %v581_v20 = vadd.f32 %v573_v33, %v516_v24  ;;  %v582_v52 = vadd.f32 %v574_v56, %v517_v22  ;;  %v671_v11 = vsel %vm670_vm9, %v655_v47, %v663_v53  ;;  %v675_v62 = vsel %vm670_vm9, %v663_v53, %v655_v47 }
 0x15c   : > { %v679_v32 = vsel %vm448_vm8, %v675_v62, 0.0  ;;  %v704_v46 = vmul.f32 %v1710_v42, %v671_v11  ;;  %v866_v38 = vsel %vm865_vm10, %v850_v61, %v858_v58  ;;  %v870_v13 = vsel %vm865_vm10, %v858_v58, %v850_v61  ;;  %1013 = vperm.xlu1 %1467, %v1592_v5  }
 0x15d   : > { %v646_v17 = vadd.f32 %v638_v27, %v581_v20  ;;  %v647_v8 = vadd.f32 %v639_v29, %v582_v52  ;;  %v703_v24 = vmul.f32 %v1710_v42, %v679_v32  ;;  %v874_v58 = vsel %vm1982_vm13, %v870_v13, 0.0 }
 0x15e   : > { %v728_v47 = vpop.permute.xlu1 %727  ;;  %v592_v59 = vpop.permute.xlu0 %591  ;;  %v875_v32 = vsel %vm1930_vm7, %v866_v38, 0.0 }
 0x15f   : > { %v711_v22 = vadd.f32 %v703_v24, %v646_v17  ;;  %v712_v33 = vadd.f32 %v704_v46, %v647_v8  ;;  %v736_v11 = vsel %vm735_vm11, %v720_v43, %v728_v47  ;;  %v740_v5 = vsel %vm735_vm11, %v728_v47, %v720_v43 }
 0x160   : > { %v768_v42 = vmul.f32 %v1834_v12, %v736_v11  ;;  %922 = vrot.lane.b32.xlu1 %v1734_v50, %s1526_s27  ;;  %v745_v52 = vsel %vm451_vm12, %v740_v5, 0.0  ;;  %v899_v38 = vmul.f32 %v1732_v49, %v875_v32  ;;  %v487_v32 = vmul.f32 %v1708_v41, %v1768_v60 }
 0x161   : > { %v769_v43 = vmul.f32 %v1834_v12, %v745_v52 }
 0x162   : > { %v776_v27 = vadd.f32 %v768_v42, %v711_v22  ;;  %v793_v29 = vpop.permute.xlu1 %792  ;;  %v2003_v53 = vpop.permute.xlu0 %786 }
 0x163   : > { %v801_v20 = vsel %vm800_vm14, %v1910_v63, %v793_v29  ;;  %v805_v62 = vsel %vm800_vm14, %v793_v29, %v1910_v63  ;;  %v777_v46 = vadd.f32 %v769_v43, %v712_v33  ;;  %v898_v63 = vmul.f32 %v1732_v49, %v874_v58 }
 0x164   : > { %v809_v12 = vsel %vm1998_vm15, %v805_v62, 0.0  ;;  %v810_v17 = vsel %vm1922_vm5, %v801_v20, 0.0  ;;  %989 = vrot.lane.b32.xlu1 %v1768_v60, %s1527_s28 }
 0x165   : > { %v833_v13 = vmul.f32 %v1893_v25, %v809_v12  ;;  %v834_v8 = vmul.f32 %v1893_v25, %v810_v17 }
 0x166   : > { %v527_v24 = vpop.permute.xlu1 %526  ;;  %v2023_v47 = vpop.permute.xlu0 %851 }
 0x167   : > { %v841_v22 = vadd.f32 %v833_v13, %v776_v27  ;;  %v842_v33 = vadd.f32 %v834_v8, %v777_v46 }
 0x168   : > { %987 = vrot.lane.b32.xlu1 %v1734_v50, %s1527_s28  ;;  %v486_v50 = vmul.f32 %v1708_v41, %v1748_v54 }
 0x169   : > { %v2029_v11 = vadd.f32 %v898_v63, %v841_v22  ;;  %v2031_v5 = vadd.f32 %v899_v38, %v842_v33 }
 0x16a   : > { %v657_v42 = vpop.permute.xlu1 %656  ;;  %v665_v52 = vpop.permute.xlu0 %664  ;;  %v518_v63 = vadd.f32 %v1740_v51, %v486_v50 }
 0x16b   : > { %2574 = vst [vmem:[#allocation10_spill] sm:$0xff] %v2029_v11  ;;  %2575 = vst [vmem:[#allocation11_spill] sm:$0xff] %v2031_v5  ;;  %v672_v25 = vsel %vm670_vm9, %v657_v42, %v665_v52  ;;  %v676_v43 = vsel %vm670_vm9, %v665_v52, %v657_v42 }
 0x16c   : > { %v681_v60 = vsel %vm448_vm8, %v676_v43, 0.0 }
 0x16e   : > { %v722_v29 = vpop.permute.xlu1 %721  ;;  %v2037_v58 = vpop.permute.xlu0 %593 }
 0x172   : > { %v2039_v49 = vpop.permute.xlu1 %916  ;;  %v2041_v27 = vpop.permute.xlu0 %658 }
 0x176   : > { %v535_v20 = vpop.permute.xlu1 %534  ;;  %v2045_v62 = vpop.permute.xlu0 %788 }
 0x177   : > { %v542_v46 = vsel %vm540_vm3, %v527_v24, %v535_v20  ;;  %v546_v12 = vsel %vm540_vm3, %v535_v20, %v527_v24  ;;  %v519_v24 = vadd.f32 %v1740_v51, %v487_v32  ;;  %v705_v51 = vmul.f32 %v1706_v40, %v681_v60 }
 0x178   : > { %v551_v17 = vsel %vm1914_vm2, %v546_v12, 0.0  ;;  %v552_v13 = vsel %vm1922_vm5, %v542_v46, 0.0  ;;  %v706_v32 = vmul.f32 %v1706_v40, %v672_v25 }
 0x179   : > { %v575_v54 = vmul.f32 %v1750_v55, %v551_v17  ;;  %v576_v8 = vmul.f32 %v1750_v55, %v552_v13 }
 0x17a   : > { %v600_v38 = vpop.permute.xlu1 %599  ;;  %v2060_v41 = vpop.permute.xlu0 %853 }
 0x17b   : > { %v607_v22 = vsel %vm605_vm4, %v592_v59, %v600_v38  ;;  %v611_v33 = vsel %vm605_vm4, %v600_v38, %v592_v59  ;;  %v583_v52 = vadd.f32 %v575_v54, %v518_v63  ;;  %v584_v50 = vadd.f32 %v576_v8, %v519_v24 }
 0x17c   : > { %v616_v42 = vsel %vm1926_vm6, %v607_v22, 0.0  ;;  %v617_v55 = vsel %vm1930_vm7, %v611_v33, 0.0 }
 0x17d   : > { %v640_v20 = vmul.f32 %v1782_v1, %v616_v42  ;;  %v641_v43 = vmul.f32 %v1782_v1, %v617_v55 }
 0x17e   : > { %v730_v46 = vpop.permute.xlu1 %729  ;;  %v2077_v12 = vpop.permute.xlu0 %918 }
 0x17f   : > { %v648_v59 = vadd.f32 %v640_v20, %v583_v52  ;;  %v649_v17 = vadd.f32 %v641_v43, %v584_v50  ;;  %v737_v13 = vsel %vm735_vm11, %v722_v29, %v730_v46  ;;  %v741_v54 = vsel %vm735_vm11, %v730_v46, %v722_v29 }
 0x180   : > { %v747_v8 = vsel %vm451_vm12, %v741_v54, 0.0  ;;  %v770_v1 = vmul.f32 %v1816_v9, %v737_v13 }
 0x181   : > { %v713_v63 = vadd.f32 %v705_v51, %v648_v59  ;;  %v714_v38 = vadd.f32 %v706_v32, %v649_v17  ;;  %v771_v40 = vmul.f32 %v1816_v9, %v747_v8 }
 0x182   : > { %v795_v25 = vpop.permute.xlu1 %794  ;;  %v537_v60 = vpop.permute.xlu0 %536 }
 0x183   : > { %v778_v24 = vadd.f32 %v770_v1, %v713_v63  ;;  %v779_v22 = vadd.f32 %v771_v40, %v714_v38  ;;  %v802_v33 = vsel %vm800_vm14, %v2003_v53, %v795_v25  ;;  %v806_v29 = vsel %vm800_vm14, %v795_v25, %v2003_v53 }
 0x184   : > { %v811_v42 = vsel %vm1998_vm15, %v806_v29, 0.0  ;;  %v812_v55 = vsel %vm1922_vm5, %v802_v33, 0.0 }
 0x185   : > { %v835_v9 = vmul.f32 %v1878_v21, %v811_v42  ;;  %v836_v52 = vmul.f32 %v1878_v21, %v812_v55 }
 0x186   : > { %v860_v50 = vpop.permute.xlu1 %859  ;;  %v2099_v20 = vpop.permute.xlu0 %731 }
 0x187   : > { %v843_v43 = vadd.f32 %v835_v9, %v778_v24  ;;  %v844_v51 = vadd.f32 %v836_v52, %v779_v22  ;;  %v867_v32 = vsel %vm865_vm10, %v2023_v47, %v860_v50  ;;  %v871_v53 = vsel %vm865_vm10, %v860_v50, %v2023_v47 }
 0x188   : > { %v876_v46 = vsel %vm1982_vm13, %v871_v53, 0.0  ;;  %v877_v59 = vsel %vm1930_vm7, %v867_v32, 0.0 }
 0x189   : > { %v900_v21 = vmul.f32 %v1852_v16, %v876_v46  ;;  %v901_v17 = vmul.f32 %v1852_v16, %v877_v59 }
 0x18a   : > { %v529_v13 = vpop.permute.xlu1 %528  ;;  %v531_v54 = vpop.permute.xlu0 %530 }
 0x18b   : > { %v908_v8 = vadd.f32 %v900_v21, %v843_v43  ;;  %v909_v1 = vadd.f32 %v901_v17, %v844_v51  ;;  %v543_v50 = vsel %vm540_vm3, %v529_v13, %v537_v60  ;;  %v2589_v43 = vld [vmem:[#allocation9_spill] sm:$0xff] }
 0x18c   : > { %v554_v59 = vsel %vm1922_vm5, %v543_v50, 0.0 }
 0x18e   : > { %v724_v63 = vpop.permute.xlu1 %723  ;;  %v2113_v38 = vpop.permute.xlu0 %725 }
 0x192   : > { %v602_v40 = vpop.permute.xlu1 %601  ;;  %v2115_v25 = vpop.permute.xlu0 %855 }
 0x193   : > { %v612_v21 = vsel %vm605_vm4, %v602_v40, %v2037_v58  ;;  %v608_v50 = vsel %vm605_vm4, %v2037_v58, %v602_v40 }
 0x196   : > { %v667_v47 = vpop.permute.xlu1 %666  ;;  %v2117_v24 = vpop.permute.xlu0 %920 }
 0x19a   : > { %v2119_v22 = vpop.permute.xlu1 %796  ;;  %v2121_v33 = vpop.permute.xlu0 %985 }
 0x19b   : > { %2576 = vst [vmem:[#allocation12_spill] sm:$0xff] %v2121_v33 }
 0x19e   : > { %v2123_v29 = vpop.permute.xlu1 %861  ;;  %v604_v16 = vpop.permute.xlu0 %603 }
 0x19f   : > { %v872_v56 = vsel %vm865_vm10, %v2123_v29, %v2060_v41 }
 0x1a2   : > { %v2125_v42 = vpop.permute.xlu1 %926  ;;  %v2127_v55 = vpop.permute.xlu0 %798 }
 0x1a6   : > { %v596_v9 = vpop.permute.xlu1 %595  ;;  %v925_v52 = vpop.permute.xlu0 %924 }
 0x1a7   : > { %v932_v51 = vsel %vm930_vm0, %v2039_v49, %v925_v52  ;;  %v936_v32 = vsel %vm930_vm0, %v925_v52, %v2039_v49  ;;  %v488_v49 = vmul.f32 %v1700_v37, %v1776_v0  ;;  %v489_v52 = vmul.f32 %v1700_v37, %v1804_v6 }
 0x1a8   : > { %v941_v53 = vsel %vm1914_vm2, %v932_v51, 0.0  ;;  %v942_v46 = vsel %vm2136_vm1, %v936_v32, 0.0  ;;  %v547_v51 = vsel %vm540_vm3, %v537_v60, %v529_v13  ;;  %v619_v0 = vsel %vm1930_vm7, %v612_v21, 0.0 }
 0x1a9   : > { %v965_v17 = vmul.f32 %v1868_v18, %v941_v53  ;;  %v966_v5 = vmul.f32 %v1868_v18, %v942_v46  ;;  %v490_v18 = vmul.f32 %v1686_v28, %v1818_v10  ;;  %v578_v53 = vmul.f32 %v1692_v31, %v554_v59 }
 0x1aa   : > { %v661_v11 = vpop.permute.xlu1 %660  ;;  %v491_v37 = vmul.f32 %v1686_v28, %v1846_v15  ;;  %v553_v6 = vsel %vm1914_vm2, %v547_v51, 0.0  ;;  %v520_v58 = vadd.f32 %v1718_v45, %v488_v49  ;;  %v618_v13 = vsel %vm1926_vm6, %v608_v50, 0.0 }
 0x1ab   : > { %v2166_v32 = vadd.f32 %v965_v17, %v908_v8  ;;  %v2168_v33 = vadd.f32 %v966_v5, %v909_v1  ;;  %v521_v5 = vadd.f32 %v1718_v45, %v489_v52  ;;  %v677_v10 = vsel %vm670_vm9, %v667_v47, %v2041_v27 }
 0x1ac   : > { %v643_v8 = vmul.f32 %v1698_v36, %v619_v0  ;;  %v609_v28 = vsel %vm605_vm4, %v596_v9, %v604_v16  ;;  %v613_v15 = vsel %vm605_vm4, %v604_v16, %v596_v9  ;;  %v522_v1 = vadd.f32 %v1704_v39, %v490_v18  ;;  %vm2325_vm4 = vmand %vm451_vm12, %vm1930_vm7 }
 0x1ad   : > { %v577_v40 = vmul.f32 %v1692_v31, %v553_v6  ;;  %v586_v45 = vadd.f32 %v578_v53, %v521_v5  ;;  %v673_v46 = vsel %vm670_vm9, %v2041_v27, %v667_v47  ;;  %v523_v59 = vadd.f32 %v1704_v39, %v491_v37 }
 0x1ae   : > { %v791_v60 = vpop.permute.xlu1 %790  ;;  %v738_v21 = vsel %vm735_vm11, %v724_v63, %v2099_v20  ;;  %v742_v17 = vsel %vm735_vm11, %v2099_v20, %v724_v63  ;;  %v642_v16 = vmul.f32 %v1698_v36, %v618_v13  ;;  %v683_v31 = vsel %vm448_vm8, %v677_v10, 0.0 }
 0x1af   : > { %v620_v49 = vsel %vm1926_vm6, %v609_v28, 0.0  ;;  %v621_v39 = vsel %vm1930_vm7, %v613_v15, 0.0  ;;  %v651_v52 = vadd.f32 %v643_v8, %v586_v45  ;;  %v708_v20 = vmul.f32 %v1788_v2, %v673_v46 }
 0x1b0   : > { %v585_v51 = vadd.f32 %v577_v40, %v520_v58  ;;  %v749_v50 = vsel %vm451_vm12, %v742_v17, 0.0  ;;  %v772_v0 = vmul.f32 %v1798_v3, %v738_v21  ;;  %v644_v37 = vmul.f32 %v1726_v48, %v620_v49 }
 0x1b1   : > { %v645_v6 = vmul.f32 %v1726_v48, %v621_v39  ;;  %v716_v15 = vadd.f32 %v708_v20, %v651_v52  ;;  %v773_v46 = vmul.f32 %v1798_v3, %v749_v50  ;;  %v808_v21 = vsel %vm800_vm14, %v2127_v55, %v791_v60 }
 0x1b2   : > { %v539_v9 = vpop.permute.xlu1 %538  ;;  %v650_v28 = vadd.f32 %v642_v16, %v585_v51  ;;  %v803_v16 = vsel %vm800_vm14, %v2045_v62, %v2119_v22 }
 0x1b3   : > { %v544_v27 = vsel %vm540_vm3, %v531_v54, %v539_v9  ;;  %v548_v47 = vsel %vm540_vm3, %v539_v9, %v531_v54  ;;  %v707_v54 = vmul.f32 %v1788_v2, %v683_v31  ;;  %v781_v9 = vadd.f32 %v773_v46, %v716_v15  ;;  %v2580_v15 = vld [vmem:[#allocation3_spill] sm:$0xff] }
 0x1b4   : > { %v555_v36 = vsel %vm1914_vm2, %v548_v47, 0.0  ;;  %v556_v63 = vsel %vm1922_vm5, %v544_v27, 0.0  ;;  %v868_v47 = vsel %vm865_vm10, %v2060_v41, %v2123_v29  ;;  %vm995_vm3 = vcmp.lt.s32.totalorder %v1897_v26, 111 }
 0x1b5   : > { %v579_v18 = vmul.f32 %v1690_v30, %v555_v36  ;;  %v580_v53 = vmul.f32 %v1690_v30, %v556_v63  ;;  %v807_v30 = vsel %vm800_vm14, %v2119_v22, %v2045_v62  ;;  %v815_v62 = vsel %vm1998_vm15, %v808_v21, 0.0 }
 0x1b6   : > { %v669_v5 = vpop.permute.xlu1 %668  ;;  %v813_v49 = vsel %vm1998_vm15, %v807_v30, 0.0  ;;  %v839_v51 = vmul.f32 %v1806_v7, %v815_v62 }
 0x1b7   : > { %v587_v13 = vadd.f32 %v579_v18, %v522_v1  ;;  %v588_v10 = vadd.f32 %v580_v53, %v523_v59  ;;  %v674_v58 = vsel %vm670_vm9, %v661_v11, %v669_v5  ;;  %v678_v8 = vsel %vm670_vm9, %v669_v5, %v661_v11 }
 0x1b8   : > { %v685_v2 = vsel %vm448_vm8, %v678_v8, 0.0  ;;  %v710_v45 = vmul.f32 %v1762_v57, %v674_v58  ;;  %v715_v59 = vadd.f32 %v707_v54, %v650_v28  ;;  %v804_v11 = vsel %vm800_vm14, %v791_v60, %v2127_v55 }
 0x1b9   : > { %v652_v48 = vadd.f32 %v644_v37, %v587_v13  ;;  %v653_v40 = vadd.f32 %v645_v6, %v588_v10  ;;  %v709_v1 = vmul.f32 %v1762_v57, %v685_v2  ;;  %v816_v22 = vsel %vm1922_vm5, %v804_v11, 0.0 }
 0x1ba   : > { %v734_v17 = vpop.permute.xlu1 %733  ;;  %v780_v36 = vadd.f32 %v772_v0, %v715_v59  ;;  %v840_v50 = vmul.f32 %v1806_v7, %v816_v22  ;;  %v837_v29 = vmul.f32 %v1870_v19, %v813_v49  ;;  %v878_v0 = vsel %vm1982_vm13, %v872_v56, 0.0 }
 0x1bb   : > { %v717_v31 = vadd.f32 %v709_v1, %v652_v48  ;;  %v739_v57 = vsel %vm735_vm11, %v2113_v38, %v734_v17  ;;  %v743_v3 = vsel %vm735_vm11, %v734_v17, %v2113_v38  ;;  %v718_v39 = vadd.f32 %v710_v45, %v653_v40  ;;  %v2583_v1 = vld [vmem:[#allocation6_spill] sm:$0xff]  ;;  %v2584_v17 = vld [vmem:[#allocation12_spill] sm:$0xff] }
 0x1bc   : > { %v751_v55 = vsel %vm451_vm12, %v743_v3, 0.0  ;;  %v774_v60 = vmul.f32 %v1696_v34, %v739_v57  ;;  %v814_v38 = vsel %vm1922_vm5, %v803_v16, 0.0  ;;  %v933_v7 = vsel %vm930_vm0, %v2077_v12, %v2125_v42 }
 0x1bd   : > { %v775_v27 = vmul.f32 %v1696_v34, %v751_v55  ;;  %v838_v53 = vmul.f32 %v1870_v19, %v814_v38  ;;  %v937_v54 = vsel %vm930_vm0, %v2125_v42, %v2077_v12  ;;  %v2579_v19 = vld [vmem:[#allocation5_spill] sm:$0xff]  ;;  %v943_v42 = vsel %vm1914_vm2, %v933_v7, 0.0  ;;  %v992_v38 = vpop.permute.xlu0 %991 }
 0x1be   : > { %v782_v52 = vadd.f32 %v774_v60, %v717_v31  ;;  %v864_v20 = vpop.permute.xlu1 %863  ;;  %v944_v28 = vsel %vm2136_vm1, %v937_v54, 0.0  ;;  %v845_v48 = vadd.f32 %v837_v29, %v780_v36  ;;  %v902_v45 = vmul.f32 %v2583_v1, %v878_v0  ;;  %v2586_v60 = vld [vmem:[#allocation2_spill] sm:$0xff] }
 0x1bf   : > { %v783_v63 = vadd.f32 %v775_v27, %v718_v39  ;;  %v869_v34 = vsel %vm865_vm10, %v2115_v25, %v864_v20  ;;  %v873_v14 = vsel %vm865_vm10, %v864_v20, %v2115_v25  ;;  %v879_v25 = vsel %vm1930_vm7, %v868_v47, 0.0 }
 0x1c0   : > { %v880_v18 = vsel %vm1982_vm13, %v873_v14, 0.0  ;;  %v881_v41 = vsel %vm1930_vm7, %v869_v34, 0.0  ;;  %v847_v37 = vadd.f32 %v839_v51, %v782_v52  ;;  %v846_v40 = vadd.f32 %v838_v53, %v781_v9 }
 0x1c1   : > { %v848_v6 = vadd.f32 %v840_v50, %v783_v63  ;;  %v904_v13 = vmul.f32 %v2579_v19, %v880_v18  ;;  %v905_v61 = vmul.f32 %v2579_v19, %v881_v41  ;;  %v903_v46 = vmul.f32 %v2583_v1, %v879_v25  ;;  %v2587_v50 = vld [vmem:[#allocation8_spill] sm:$0xff] }
 0x1c2   : > { %v929_v5 = vpop.permute.xlu1 %928  ;;  %v967_v31 = vmul.f32 %v2585_v23, %v943_v42  ;;  %v968_v57 = vmul.f32 %v2585_v23, %v944_v28  ;;  %v910_v39 = vadd.f32 %v902_v45, %v845_v48  ;;  %vm1259_vm12 = vcmask 261120  }
 0x1c3   : > { %v934_v10 = vsel %vm930_vm0, %v2117_v24, %v929_v5  ;;  %v938_v58 = vsel %vm930_vm0, %v929_v5, %v2117_v24  ;;  %v912_v11 = vadd.f32 %v904_v13, %v847_v37  ;;  %v913_v21 = vadd.f32 %v905_v61, %v848_v6 }
 0x1c4   : > { %v945_v8 = vsel %vm1914_vm2, %v934_v10, 0.0  ;;  %v946_v12 = vsel %vm2136_vm1, %v938_v58, 0.0  ;;  %v911_v27 = vadd.f32 %v903_v46, %v846_v40  ;;  %v975_v63 = vadd.f32 %v967_v31, %v910_v39  ;;  %v2590_v39 = vld [vmem:[#allocation10_spill] sm:$0xff] }
 0x1c5   : > { %v969_v30 = vmul.f32 %v2580_v15, %v945_v8  ;;  %v970_v2 = vmul.f32 %v2580_v15, %v946_v12  ;;  %v915_v12 = vpop.permute.xlu0 %914 }
 0x1c6   : > { %v994_v59 = vpop.permute.xlu1 %993  ;;  %v976_v51 = vadd.f32 %v968_v57, %v911_v27 }
 0x1c7   : > { %v999_v16 = vsel %vm995_vm3, %v2584_v17, %v994_v59  ;;  %v1003_v35 = vsel %vm995_vm3, %v994_v59, %v2584_v17  ;;  %v977_v49 = vadd.f32 %v969_v30, %v912_v11  ;;  %v978_v55 = vadd.f32 %v970_v2, %v913_v21  ;;  %v2588_v11 = vld [vmem:[#allocation4_spill] sm:$0xff] }
 0x1c8   : > { %v1010_v3 = vsel %vm1926_vm6, %v999_v16, 0.0  ;;  %v1011_v9 = vsel %vm2325_vm4, %v1003_v35, 0.0 }
 0x1c9   : > { %v1034_v62 = vmul.f32 %v2586_v60, %v1010_v3  ;;  %v1035_v22 = vmul.f32 %v2586_v60, %v1011_v9  ;;  %v982_v45 = vpop.permute.xlu0 %981 }
 0x1ca   : > { %v984_v47 = vpop.permute.xlu1 %983 }
 0x1cb   : > { %v998_v56 = vsel %vm995_vm3, %v984_v47, %v992_v38  ;;  %v1002_v52 = vsel %vm995_vm3, %v992_v38, %v984_v47  ;;  %v2349_v20 = vadd.f32 %v1035_v22, %v978_v55  ;;  %v2351_v36 = vadd.f32 %v1034_v62, %v977_v49 }
 0x1cc   : > { %v1008_v34 = vsel %vm1926_vm6, %v998_v56, 0.0  ;;  %v1009_v14 = vsel %vm2325_vm4, %v1002_v52, 0.0 }
 0x1cd   : > { %v1032_v18 = vmul.f32 %v2587_v50, %v1008_v34  ;;  %v1033_v41 = vmul.f32 %v2587_v50, %v1009_v14  ;;  %v2360_v29 = vmul.f32 0.70710677, %v2349_v20  ;;  %v2363_v53 = vmul.f32 0.70710677, %v2351_v36  ;;  %v980_v60 = vpop.permute.xlu0 %979  ;;  %v2591_v14 = vld [vmem:[#allocation11_spill] sm:$0xff] }
 0x1cf   : > { %v2365_v0 = vadd.f32 %v1032_v18, %v975_v63  ;;  %v2367_v25 = vadd.f32 %v1033_v41, %v976_v51  ;;  %v1067_v7 = vand.u32 2147483647, %v2360_v29  ;;  %v2371_v54 = vand.u32 2147483647, %v2363_v53 }
 0x1d1   : > { %v2374_v37 = vmul.f32 0.70710677, %v2365_v0  ;;  %v2377_v6 = vmul.f32 0.70710677, %v2367_v25  ;;  %v1075_v5 = vmul.f32 0.3275911, %v1067_v7 }
 0x1d2   : > { %v1074_v8 = vmul.f32 0.3275911, %v2371_v54  ;;  %v1171_v48 = vsub.f32 0.0, %v1067_v7  ;;  %v1170_v49 = vsub.f32 0.0, %v2371_v54 }
 0x1d3   : > { %v1064_v19 = vand.u32 2147483647, %v2374_v37  ;;  %v1065_v13 = vand.u32 2147483647, %v2377_v6  ;;  %v1083_v61 = vadd.f32 1.0, %v1075_v5  ;;  %vm1216_vm5 = vcmp.ge.f32.partialorder %v2374_v37, 0.0 }
 0x1d4   : > { %v1082_v30 = vadd.f32 1.0, %v1074_v8  ;;  %v1179_v16 = vmul.f32 %v1171_v48, %v1067_v7  ;;  %vm1217_vm7 = vcmp.ge.f32.partialorder %v2377_v6, 0.0  ;;  %v1049_v37 = vmul.f32 0.5, %v2367_v25 }
 0x1d5   : > { %v1072_v10 = vmul.f32 0.3275911, %v1064_v19  ;;  %v1073_v58 = vmul.f32 0.3275911, %v1065_v13  ;;  %1470 = vrcp.f32 %v1083_v61  ;;  %v1168_v62 = vsub.f32 0.0, %v1064_v19 }
 0x1d6   : > { %v1169_v22 = vsub.f32 0.0, %v1065_v13  ;;  %v1194_v47 = vmul.f32 1.442695, %v1179_v16 }
 0x1d7   : > { %v1080_v42 = vadd.f32 1.0, %v1072_v10  ;;  %v1081_v28 = vadd.f32 1.0, %v1073_v58  ;;  %v1014_v15 = vpop.permute.xlu1 %1013  ;;  %v1176_v10 = vmul.f32 %v1168_v62, %v1064_v19 }
 0x1d8   : > { %v1177_v44 = vmul.f32 %v1169_v22, %v1065_v13 }
 0x1d9   : > { %1472 = vrcp.f32 %v1080_v42 }
 0x1da   : > { %1474 = vrcp.f32 %v1081_v28 }
 0x1db   : > { %v923_v2 = vpop.permute.xlu1 %922  ;;  %1476 = vrcp.f32 %v1082_v30 }
 0x1dc   : > { %v931_v40 = vsel %vm930_vm0, %v915_v12, %v923_v2  ;;  %v935_v1 = vsel %vm930_vm0, %v923_v2, %v915_v12  ;;  %v1178_v2 = vmul.f32 %v1170_v49, %v2371_v54  ;;  %1478 = vpow2.f32 %v1194_v47 }
 0x1dd   : > { %v939_v46 = vsel %vm1914_vm2, %v931_v40, 0.0  ;;  %v940_v59 = vsel %vm2136_vm1, %v935_v1, 0.0  ;;  %vm1219_vm2 = vcmp.ge.f32.partialorder %v2360_v29, 0.0 }
 0x1de   : > { %v963_v21 = vmul.f32 %v2588_v11, %v939_v46  ;;  %v964_v31 = vmul.f32 %v2588_v11, %v940_v59  ;;  %v1188_v59 = vmul.f32 1.442695, %v1176_v10  ;;  %v1190_v11 = vmul.f32 1.442695, %v1177_v44 }
 0x1df   : > { %v990_v17 = vpop.permute.xlu1 %989 }
 0x1e0   : > { %v997_v35 = vsel %vm995_vm3, %v982_v45, %v990_v17  ;;  %v1001_v23 = vsel %vm995_vm3, %v990_v17, %v982_v45  ;;  %v971_v27 = vadd.f32 %v963_v21, %v2590_v39  ;;  %v972_v51 = vadd.f32 %v964_v31, %v2591_v14 }
 0x1e1   : > { %v1006_v4 = vsel %vm1926_vm6, %v997_v35, 0.0  ;;  %v1007_v57 = vsel %vm2325_vm4, %v1001_v23, 0.0  ;;  %v1192_v31 = vmul.f32 1.442695, %v1178_v2  ;;  %v1051_v2 = vmul.f32 0.5, %v2349_v20 }
 0x1e2   : > { %v1030_v3 = vmul.f32 %v2589_v43, %v1006_v4  ;;  %v1031_v9 = vmul.f32 %v2589_v43, %v1007_v57  ;;  %v2403_v55 = vpop.eup %1470 }
 0x1e3   : > { %v988_v38 = vpop.permute.xlu1 %987 }
 0x1e4   : > { %v2407_v56 = vadd.f32 %v1030_v3, %v2166_v32  ;;  %v2410_v52 = vadd.f32 %v1031_v9, %v2168_v33  ;;  %v996_v63 = vsel %vm995_vm3, %v980_v60, %v988_v38  ;;  %v1000_v34 = vsel %vm995_vm3, %v988_v38, %v980_v60 }
 0x1e5   : > { %v1004_v50 = vsel %vm1926_vm6, %v996_v63, 0.0  ;;  %v1005_v18 = vsel %vm2325_vm4, %v1000_v34, 0.0  ;;  %v1099_v32 = vmul.f32 1.0614054, %v2403_v55  ;;  %vm1218_vm6 = vcmp.ge.f32.partialorder %v2363_v53, 0.0 }
 0x1e6   : > { %v2422_v41 = vpop.eup %1472  ;;  %v2425_v33 = vmul.f32 0.70710677, %v2407_v56  ;;  %v2428_v7 = vmul.f32 0.70710677, %v2410_v52  ;;  %v1028_v26 = vmul.f32 %v1014_v15, %v1004_v50  ;;  %v1029_v5 = vmul.f32 %v1014_v15, %v1005_v18 }
 0x1e7   : > { %v2430_v61 = vpop.eup %1474  ;;  %v1107_v58 = vadd.f32 -1.4531521, %v1099_v32  ;;  %v1096_v24 = vmul.f32 1.0614054, %v2422_v41 }
 0x1e8   : > { %v1062_v8 = vand.u32 2147483647, %v2425_v33  ;;  %v1063_v12 = vand.u32 2147483647, %v2428_v7  ;;  %v2435_v42 = vadd.f32 %v1028_v26, %v971_v27  ;;  %v2437_v28 = vadd.f32 %v1029_v5, %v972_v51  ;;  %v2442_v48 = vpop.eup %1476 }
 0x1e9   : > { %v1115_v30 = vmul.f32 %v2403_v55, %v1107_v58  ;;  %v1097_v15 = vmul.f32 1.0614054, %v2430_v61  ;;  %v1104_v40 = vadd.f32 -1.4531521, %v1096_v24  ;;  %v1098_v23 = vmul.f32 1.0614054, %v2442_v48  ;;  %v1479_v10 = vpop.eup %1478 }
 0x1ea   : > { %v1070_v19 = vmul.f32 0.3275911, %v1062_v8  ;;  %v1071_v13 = vmul.f32 0.3275911, %v1063_v12  ;;  %v2445_v1 = vmul.f32 0.70710677, %v2435_v42 }
 0x1eb   : > { %v2448_v45 = vmul.f32 0.70710677, %v2437_v28  ;;  %v1123_v46 = vadd.f32 1.4214138, %v1115_v30  ;;  %v1105_v4 = vadd.f32 -1.4531521, %v1097_v15  ;;  %v1112_v3 = vmul.f32 %v2422_v41, %v1104_v40 }
 0x1ec   : > { %v1078_v21 = vadd.f32 1.0, %v1070_v19  ;;  %v1079_v17 = vadd.f32 1.0, %v1071_v13  ;;  %v1060_v54 = vand.u32 2147483647, %v2445_v1  ;;  %v1106_v49 = vadd.f32 -1.4531521, %v1098_v23 }
 0x1ed   : > { %v1061_v16 = vand.u32 2147483647, %v2448_v45  ;;  %v1131_v35 = vmul.f32 %v2403_v55, %v1123_v46  ;;  %v1166_v60 = vsub.f32 0.0, %v1062_v8  ;;  %v1113_v38 = vmul.f32 %v2430_v61, %v1105_v4 }
 0x1ee   : > { %1480 = vrcp.f32 %v1078_v21  ;;  %v1068_v57 = vmul.f32 0.3275911, %v1060_v54  ;;  %v1114_v27 = vmul.f32 %v2442_v48, %v1106_v49  ;;  %v1167_v47 = vsub.f32 0.0, %v1063_v12 }
 0x1ef   : > { %1482 = vrcp.f32 %v1079_v17  ;;  %v1069_v43 = vmul.f32 0.3275911, %v1061_v16  ;;  %v1139_v9 = vadd.f32 -0.28449672, %v1131_v35  ;;  %v1120_v63 = vadd.f32 1.4214138, %v1112_v3 }
 0x1f0   : > { %1484 = vpow2.f32 %v1188_v59  ;;  %v1076_v62 = vadd.f32 1.0, %v1068_v57  ;;  %v1122_v14 = vadd.f32 1.4214138, %v1114_v27  ;;  %v1174_v51 = vmul.f32 %v1166_v60, %v1062_v8 }
 0x1f1   : > { %1486 = vpow2.f32 %v1190_v11  ;;  %v1077_v22 = vadd.f32 1.0, %v1069_v43  ;;  %v1147_v39 = vmul.f32 %v2403_v55, %v1139_v9  ;;  %v1121_v50 = vadd.f32 1.4214138, %v1113_v38 }
 0x1f2   : > { %1488 = vpow2.f32 %v1192_v31  ;;  %v1128_v18 = vmul.f32 %v2422_v41, %v1120_v63  ;;  %v1164_v32 = vsub.f32 0.0, %v1060_v54  ;;  %v1130_v5 = vmul.f32 %v2442_v48, %v1122_v14 }
 0x1f3   : > { %1490 = vrcp.f32 %v1076_v62  ;;  %v1155_v34 = vadd.f32 0.2548296, %v1147_v39  ;;  %v1175_v44 = vmul.f32 %v1167_v47, %v1063_v12  ;;  %v1129_v58 = vmul.f32 %v2430_v61, %v1121_v50 }
 0x1f4   : > { %1492 = vrcp.f32 %v1077_v22  ;;  %v1136_v24 = vadd.f32 -0.28449672, %v1128_v18  ;;  %v1165_v30 = vsub.f32 0.0, %v1061_v16  ;;  %v1138_v19 = vadd.f32 -0.28449672, %v1130_v5 }
 0x1f5   : > { %v1163_v26 = vmul.f32 %v2403_v55, %v1155_v34  ;;  %v1184_v13 = vmul.f32 1.442695, %v1174_v51  ;;  %v2464_v8 = vmul.f32 0.5, %v2351_v36  ;;  %v1137_v40 = vadd.f32 -0.28449672, %v1129_v58 }
 0x1f6   : > { %v1144_v46 = vmul.f32 %v2422_v41, %v1136_v24  ;;  %v1172_v55 = vmul.f32 %v1164_v32, %v1060_v54  ;;  %v1146_v12 = vmul.f32 %v2442_v48, %v1138_v19  ;;  %v1186_v21 = vmul.f32 1.442695, %v1175_v44 }
 0x1f7   : > { %v1203_v15 = vmul.f32 %v1479_v10, %v1163_v26  ;;  %v1145_v20 = vmul.f32 %v2430_v61, %v1137_v40  ;;  %v2473_v17 = vmul.f32 0.5, %v2365_v0  ;;  %v1173_v23 = vmul.f32 %v1165_v30, %v1061_v16 }
 0x1f8   : > { %v1152_v35 = vadd.f32 0.2548296, %v1144_v46  ;;  %v1154_v4 = vadd.f32 0.2548296, %v1146_v12  ;;  %1494 = vpow2.f32 %v1184_v13  ;;  %v1180_v49 = vmul.f32 1.442695, %v1172_v55 }
 0x1f9   : > { %v1211_v59 = vsub.f32 1.0, %v1203_v15  ;;  %v1153_v43 = vadd.f32 0.2548296, %v1145_v20  ;;  %1496 = vpow2.f32 %v1186_v21  ;;  %vm1214_vm8 = vcmp.ge.f32.partialorder %v2425_v33, 0.0 }
 0x1fa   : > { %v1160_v3 = vmul.f32 %v2422_v41, %v1152_v35  ;;  %v1162_v60 = vmul.f32 %v2442_v48, %v1154_v4  ;;  %v1182_v41 = vmul.f32 1.442695, %v1173_v23  ;;  %1498 = vpow2.f32 %v1180_v49 }
 0x1fb   : > { %v2469_v11 = vpop.eup %1480  ;;  %v1227_v31 = vsub.f32 0.0, %v1211_v59  ;;  %v1161_v27 = vmul.f32 %v2430_v61, %v1153_v43  ;;  %vm1215_vm9 = vcmp.ge.f32.partialorder %v2428_v7, 0.0  ;;  %vm1213_vm10 = vcmp.ge.f32.partialorder %v2448_v45, 0.0  ;;  %v1252_v45 = vld [vmem:[%s2542_s5] sm:$0xf] }
 0x1fc   : > { %v2475_v36 = vpop.eup %1482  ;;  %v1094_v54 = vmul.f32 1.0614054, %v2469_v11  ;;  %1500 = vpow2.f32 %v1182_v41  ;;  %vm1212_vm11 = vcmp.ge.f32.partialorder %v2445_v1, 0.0 }
 0x1fd   : > { %v1485_v57 = vpop.eup %1484  ;;  %v1095_v0 = vmul.f32 1.0614054, %v2475_v36  ;;  %v1235_v16 = vsel %vm1219_vm2, %v1211_v59, %v1227_v31 }
 0x1fe   : > { %v1487_v9 = vpop.eup %1486  ;;  %v1102_v62 = vadd.f32 -1.4531521, %v1094_v54  ;;  %v1243_v39 = vadd.f32 1.0, %v1235_v16  ;;  %v1200_v38 = vmul.f32 %v1485_v57, %v1160_v3 }
 0x1ff   : > { %v1489_v22 = vpop.eup %1488  ;;  %v1103_v47 = vadd.f32 -1.4531521, %v1095_v0  ;;  %v1201_v48 = vmul.f32 %v1487_v9, %v1161_v27 }
 0x200   : > { %v2487_v63 = vpop.eup %1490  ;;  %v1202_v34 = vmul.f32 %v1489_v22, %v1162_v60  ;;  %v1110_v14 = vmul.f32 %v2469_v11, %v1102_v62  ;;  %v1251_v51 = vmul.f32 %v1243_v39, %v1051_v2  ;;  %v1208_v50 = vsub.f32 1.0, %v1200_v38 }
 0x201   : > { %v2490_v29 = vpop.eup %1492  ;;  %v1111_v18 = vmul.f32 %v2475_v36, %v1103_v47  ;;  %v1209_v5 = vsub.f32 1.0, %v1201_v48  ;;  %v1092_v58 = vmul.f32 1.0614054, %v2487_v63 }
 0x202   : > { %v1210_v32 = vsub.f32 1.0, %v1202_v34  ;;  %v1118_v26 = vadd.f32 1.4214138, %v1110_v14  ;;  %v1093_v61 = vmul.f32 1.0614054, %v2490_v29  ;;  %1287 = vmatprep.subr.mxu1 %v1251_v51  ;;  %v1224_v10 = vsub.f32 0.0, %v1208_v50 }
 0x203   : > { %v1119_v44 = vadd.f32 1.4214138, %v1111_v18  ;;  %v1225_v15 = vsub.f32 0.0, %v1209_v5  ;;  %v1100_v40 = vadd.f32 -1.4531521, %v1092_v58 }
 0x204   : > { %v1226_v24 = vsub.f32 0.0, %v1210_v32  ;;  %v1126_v30 = vmul.f32 %v2469_v11, %v1118_v26  ;;  %v1101_v2 = vadd.f32 -1.4531521, %v1093_v61  ;;  %v1232_v19 = vsel %vm1216_vm5, %v1208_v50, %v1224_v10 }
 0x205   : > { %v1127_v13 = vmul.f32 %v2475_v36, %v1119_v44  ;;  %v1240_v55 = vadd.f32 1.0, %v1232_v19  ;;  %v1233_v20 = vsel %vm1217_vm7, %v1209_v5, %v1225_v15  ;;  %v1108_v23 = vmul.f32 %v2487_v63, %v1100_v40  ;;  %v1495_v0 = vpop.eup %1494 }
 0x206   : > { %v1234_v46 = vsel %vm1218_vm6, %v1210_v32, %v1226_v24  ;;  %v1134_v59 = vadd.f32 -0.28449672, %v1126_v30  ;;  %v1109_v12 = vmul.f32 %v2490_v29, %v1101_v2  ;;  %v1241_v31 = vadd.f32 1.0, %v1233_v20  ;;  %v1497_v22 = vpop.eup %1496 }
 0x207   : > { %v1242_v21 = vadd.f32 1.0, %v1234_v46  ;;  %v1135_v35 = vadd.f32 -0.28449672, %v1127_v13  ;;  %v1248_v57 = vmul.f32 %v1240_v55, %v2473_v17  ;;  %v1116_v3 = vadd.f32 1.4214138, %v1108_v23  ;;  %v1499_v38 = vpop.eup %1498 }
 0x208   : > { %v1142_v4 = vmul.f32 %v2469_v11, %v1134_v59  ;;  %v1117_v54 = vadd.f32 1.4214138, %v1109_v12  ;;  %v1249_v9 = vmul.f32 %v1241_v31, %v1049_v37  ;;  %v1046_v10 = vmul.f32 0.5, %v2407_v56  ;;  %v1257_v12 = vpop.permute.xlu0 %1256 }
 0x209   : > { %v1250_v53 = vmul.f32 %v1242_v21, %v2464_v8  ;;  %v1143_v43 = vmul.f32 %v2475_v36, %v1135_v35  ;;  %v1124_v25 = vmul.f32 %v2487_v63, %v1116_v3  ;;  %v1501_v51 = vpop.eup %1500  ;;  %v1047_v24 = vmul.f32 0.5, %v2410_v52 }
 0x20a   : > { %v1150_v6 = vadd.f32 0.2548296, %v1142_v4  ;;  %v1125_v49 = vmul.f32 %v2490_v29, %v1117_v54  ;;  %v1045_v56 = vmul.f32 0.5, %v2437_v28  ;;  %v1044_v52 = vmul.f32 0.5, %v2435_v42 }
 0x20b   : > { %1288 = vmatpush1.msra.mxu1 %v1250_v53  ;;  %v1151_v16 = vadd.f32 0.2548296, %v1143_v43  ;;  %v1132_v17 = vadd.f32 -0.28449672, %v1124_v25 }
 0x20c   : > { %1289 = vmatprep.subr.mxu1 %v1249_v9  ;;  %v1158_v60 = vmul.f32 %v2469_v11, %v1150_v6  ;;  %v1133_v62 = vadd.f32 -0.28449672, %v1125_v49 }
 0x20d   : > { %1290 = vmatpush1.msra.mxu1 %v1248_v57  ;;  %v1159_v8 = vmul.f32 %v2475_v36, %v1151_v16  ;;  %v1140_v41 = vmul.f32 %v2487_v63, %v1132_v17 }
 0x20e   : > { %v1198_v39 = vmul.f32 %v1495_v0, %v1158_v60  ;;  %v1141_v27 = vmul.f32 %v2490_v29, %v1133_v62 }
 0x20f   : > { %v1199_v47 = vmul.f32 %v1497_v22, %v1159_v8  ;;  %v1148_v50 = vadd.f32 0.2548296, %v1140_v41 }
 0x210   : > { %v1206_v34 = vsub.f32 1.0, %v1198_v39  ;;  %v1149_v14 = vadd.f32 0.2548296, %v1141_v27 }
 0x211   : > { %v1207_v48 = vsub.f32 1.0, %v1199_v47  ;;  %v1156_v36 = vmul.f32 %v2487_v63, %v1148_v50 }
 0x212   : > { %v1222_v18 = vsub.f32 0.0, %v1206_v34  ;;  %v1157_v11 = vmul.f32 %v2490_v29, %v1149_v14 }
 0x213   : > { %v1223_v32 = vsub.f32 0.0, %v1207_v48  ;;  %v1196_v58 = vmul.f32 %v1499_v38, %v1156_v36 }
 0x214   : > { %v1230_v26 = vsel %vm1214_vm8, %v1206_v34, %v1222_v18  ;;  %v1197_v61 = vmul.f32 %v1501_v51, %v1157_v11 }
 0x215   : > { %v1231_v5 = vsel %vm1215_vm9, %v1207_v48, %v1223_v32  ;;  %v1238_v44 = vadd.f32 1.0, %v1230_v26  ;;  %v1204_v29 = vsub.f32 1.0, %v1196_v58 }
 0x216   : > { %v1239_v30 = vadd.f32 1.0, %v1231_v5  ;;  %v1205_v2 = vsub.f32 1.0, %v1197_v61 }
 0x217   : > { %v1246_v15 = vmul.f32 %v1238_v44, %v1046_v10  ;;  %v1220_v33 = vsub.f32 0.0, %v1204_v29 }
 0x218   : > { %v1247_v19 = vmul.f32 %v1239_v30, %v1047_v24  ;;  %v1221_v13 = vsub.f32 0.0, %v1205_v2 }
 0x219   : > { %v1228_v40 = vsel %vm1212_vm11, %v1204_v29, %v1220_v33 }
 0x21a   : > { %1291 = vmatprep.subr.mxu1 %v1247_v19  ;;  %v1229_v7 = vsel %vm1213_vm10, %v1205_v2, %v1221_v13  ;;  %v1236_v46 = vadd.f32 1.0, %v1228_v40 }
 0x21b   : > { %1292 = vmatpush1.msra.mxu1 %v1246_v15  ;;  %v1237_v63 = vadd.f32 1.0, %v1229_v7 }
 0x21c   : > { %v1244_v59 = vmul.f32 %v1236_v46, %v1044_v52 }
 0x21d   : > { %v1245_v55 = vmul.f32 %v1237_v63, %v1045_v56 }
 0x21f   : > { %1293 = vmatprep.subr.mxu1 %v1245_v55 }
 0x220   : > { %1294 = vmatpush1.msra.mxu1 %v1244_v59 }
 0x221   : > { %1409 = vmatmul.mubr.msk.f32.vlgmr.msra.gmra.mxu1 %vm1259_vm12, %v1252_v45 }
 0x2e1   : > { %v1329_v1 = vpop.f32.mrf.mxu1 }
 0x2e2   : > { %v1330_v28 = vadd.f32 %v1329_v1, %v1257_v12 }
 0x2e3   : > { %v1331_v21 = vpop.f32.mrf.mxu1 }
 0x2e4   : > { %v1332_v20 = vadd.f32 %v1331_v21, %v1257_v12 }
 0x2e6   : > { %v1336_v42 = vcombine.low %v1330_v28, %v1332_v20 }
 0x2e8   : > { %1338 = vst [vmem:[%s278_s13] sm:$0xff] %v1336_v42 }
 0x2e9 PF: > { %s17_s24 = sadd.s32 1, %s1508_s24  }
 0x2ea   : > { %p14_p4 = scmp.ge.s32.totalorder %s17_s24, 4  }
 0x2ec   :  { %16 = sbr.rel (!%p14_p4) target bundleno = 1 (0x1), region = 78 }

</bundles_post_ra>
